<compile_context>
chip_gen: v7x
topology: tpu7x:2x2x1
jax: 0.10.0
libtpu: 0.0.40
codegen_flags: <defaults>
</compile_context>

<pallas_src>
import math

import jax
import jax.numpy as jnp
from jax import lax
from jax.experimental import pallas as pl
from jax.experimental.pallas import tpu as pltpu


# Row indices of the packed (1, D) bias / LayerNorm vectors (one (11, D) input).
_BQ, _BK, _BV, _BO, _B2, _G1, _E1, _G2, _E2, _GO, _EO = range(11)
_N_VEC = 11
_NEG_INF = -1e30


def _layernorm(v, gamma, beta, eps):
    """Single-pass LayerNorm: sum and sum-of-squares (independent reductions)."""
    v = v.astype(jnp.float32)
    inv_n = 1.0 / v.shape[-1]
    mu = jnp.sum(v, axis=-1, keepdims=True) * inv_n
    ms = jnp.sum(v * v, axis=-1, keepdims=True) * inv_n
    var = jnp.maximum(ms - mu * mu, 0.0)
    return (v - mu) * lax.rsqrt(var + eps) * gamma + beta


def _tile_forward(xq_f32, q, k, v, wo_ref, w1_ref, w2_ref, b1_ref, vec_ref,
                  ctx_sc, *, nhead, head_dim, n_valid, s_pad, exact_softmax):
    """Attention + FFN + the three LayerNorms for one (tq, D) query tile.

    q : (tq, D) f32 (already bias-added and pre-scaled by 1/sqrt(Dh))
    k, v : (s_pad, D) bf16
    """
    def vrow(i):
        return vec_ref[i:i + 1, :]

    q_bf = q.astype(jnp.bfloat16)

    kbias = None
    if n_valid is not None and n_valid != s_pad:
        kmask = lax.broadcasted_iota(jnp.int32, (1, s_pad), 1) < n_valid
        kbias = jnp.where(kmask, 0.0, _NEG_INF).astype(jnp.float32)

    for h in range(nhead):                                       # static unroll
        sl = slice(h * head_dim, (h + 1) * head_dim)
        qh, kh, vh = q_bf[:, sl], k[:, sl], v[:, sl]
        s = lax.dot_general(qh, kh, (((1,), (1,)), ((), ())),
                            preferred_element_type=jnp.float32)  # (tq, s_pad)
        if kbias is not None:
            s = s + kbias
        s = s - jnp.max(s, axis=-1, keepdims=True)
        # TODO(synk): bf16 exp roughly doubles EUP throughput on v6e/v7x.
        p = jnp.exp(s)
        l = jnp.sum(p, axis=-1, keepdims=True)
        inv = (1.0 / l) if exact_softmax else pl.reciprocal(l, approx=True)
        p = (p * inv).astype(jnp.bfloat16)
        ctx_sc[:, sl] = jnp.dot(p, vh, preferred_element_type=jnp.float32)

    # Single full-width (K = D) output projection from the staged contexts.
    attn = (jnp.dot(ctx_sc[...].astype(jnp.bfloat16), wo_ref[...],
                    preferred_element_type=jnp.float32) + vrow(_BO))

    # Encoder-layer residuals + LayerNorms (eps = 1e-5).
    h1 = _layernorm(xq_f32 + attn, vrow(_G1), vrow(_E1), 1e-5)
    ff = jnp.maximum(
        jnp.dot(h1.astype(jnp.bfloat16), w1_ref[...],
                preferred_element_type=jnp.float32) + b1_ref[...], 0.0)
    ff = (jnp.dot(ff.astype(jnp.bfloat16), w2_ref[...],
                  preferred_element_type=jnp.float32) + vrow(_B2))
    h2 = _layernorm(h1 + ff, vrow(_G2), vrow(_E2), 1e-5)

    # Outer module: x + LayerNorm_eps1e-6(x2)  (dropout = identity in eval mode).
    return xq_f32 + _layernorm(h2, vrow(_GO), vrow(_EO), 1e-6)


def _make_fused_kv_kernel(nhead, head_dim, tq, s_pad, n_valid, exact_softmax):
    """K/V projected in-kernel once per batch element into bf16 VMEM scratch."""
    scale = 1.0 / math.sqrt(head_dim)

    def kernel(x_ref, wq_ref, wk_ref, wv_ref, wo_ref, w1_ref, w2_ref, b1_ref,
               vec_ref, o_ref, k_sc, v_sc, ctx_sc):
        qt = pl.program_id(1)

        @pl.when(qt == 0)
        def _():
            x_full = x_ref[0].astype(jnp.bfloat16)                  # (s_pad, D)
            kk = (jnp.dot(x_full, wk_ref[...],
                          preferred_element_type=jnp.float32)
                  + vec_ref[_BK:_BK + 1, :])
            vv = (jnp.dot(x_full, wv_ref[...],
                          preferred_element_type=jnp.float32)
                  + vec_ref[_BV:_BV + 1, :])
            k_sc[...] = kk.astype(jnp.bfloat16)
            v_sc[...] = vv.astype(jnp.bfloat16)

        row0 = pl.multiple_of(qt * tq, tq)
        xq = x_ref[0, pl.ds(row0, tq), :].astype(jnp.float32)        # (tq, D)
        q = (jnp.dot(xq.astype(jnp.bfloat16), wq_ref[...],
                     preferred_element_type=jnp.float32)
             + vec_ref[_BQ:_BQ + 1, :]) * scale
        out = _tile_forward(xq, q, k_sc[...], v_sc[...], wo_ref, w1_ref, w2_ref,
                            b1_ref, vec_ref, ctx_sc, nhead=nhead,
                            head_dim=head_dim, n_valid=n_valid, s_pad=s_pad,
                            exact_softmax=exact_softmax)
        o_ref[0] = out.astype(o_ref.dtype)

    return kernel


def _make_hoisted_kv_kernel(nhead, head_dim, tq, s_pad, n_valid, exact_softmax):
    """K/V precomputed in the wrapper (small-batch / megacore-friendly path)."""
    scale = 1.0 / math.sqrt(head_dim)

    def kernel(x_ref, k_ref, v_ref, wq_ref, wo_ref, w1_ref, w2_ref, b1_ref,
               vec_ref, o_ref, ctx_sc):
        xq = x_ref[0].astype(jnp.float32)                            # (tq, D)
        q = (jnp.dot(xq.astype(jnp.bfloat16), wq_ref[...],
                     preferred_element_type=jnp.float32)
             + vec_ref[_BQ:_BQ + 1, :]) * scale
        out = _tile_forward(xq, q, k_ref[0], v_ref[0], wo_ref, w1_ref, w2_ref,
                            b1_ref, vec_ref, ctx_sc, nhead=nhead,
                            head_dim=head_dim, n_valid=n_valid, s_pad=s_pad,
                            exact_softmax=exact_softmax)
        o_ref[0] = out.astype(o_ref.dtype)

    return kernel


def _vmem_capacity_bytes():
    try:
        return int(pltpu.get_tpu_info().vmem_capacity_bytes)
    except Exception:
        return 128 * 1024 * 1024


def _choose_tile(S, max_tq):
    """Return (tq, s_pad): s_pad % tq == 0; tq % 8 == 0 unless a single tile."""
    if S <= max_tq:
        return S, S
    top = max_tq - max_tq % 8
    for t in range(top, 7, -8):
        if S % t == 0:
            return t, S
    return top, -(-S // top) * top   # pad S; padded keys are masked in-kernel


def _vmem_estimate(tq, s_pad, D, F, hoist_kv, single_buffer):
    """Rough per-core VMEM footprint (bytes) for the chosen tiling."""
    wbuf = 1 if single_buffer else 2
    weights = wbuf * 2 * (4 * D * D + 2 * D * F)                 # bf16 weights
    smalls = wbuf * 4 * (16 * max(D, 128) + 8 * max(F, 128))     # padded bias tiles
    if hoist_kv:
        stream = 2 * 4 * tq * D + 2 * 2 * 2 * s_pad * D          # x tile + bf16 K/V
        scratch = 4 * tq * D                                     # ctx (f32)
    else:
        stream = 2 * 4 * s_pad * D                               # full-seq x block
        scratch = 2 * 2 * s_pad * D + 4 * tq * D                 # bf16 K/V + ctx
    out_io = 2 * 4 * tq * D
    live = 3 * 4 * tq * s_pad + 2 * 4 * tq * F + 8 * 4 * tq * D
    return weights + smalls + stream + scratch + out_io + live


def _run(x, params, nhead, max_tq, hoist_kv, exact_softmax, single_buffer):
    B, S, D = x.shape
    head_dim = D // nhead
    F = params["w1"].shape[1]
    if hoist_kv is None:
        hoist_kv = (B == 1)     # fewer batches than TensorCores -> parallel q-tiles

    vmem_cap = _vmem_capacity_bytes()
    if max_tq is None:
        max_tq = 256 if vmem_cap <= 64 * 1024 * 1024 else 512    # v7x: 64 MiB/TC
    max_tq = max(8, max_tq)

    tq, s_pad = _choose_tile(S, max_tq)
    while tq > 8 and _vmem_estimate(tq, s_pad, D, F, hoist_kv,
                                    single_buffer) > int(0.8 * vmem_cap):
        tq, s_pad = _choose_tile(S, max(8, tq // 2))
    n_qt = s_pad // tq
    n_valid = S if s_pad != S else None

    est = _vmem_estimate(tq, s_pad, D, F, hoist_kv, single_buffer)
    vmem_limit = int(min(0.9 * vmem_cap, max(32 * 1024 * 1024, 1.5 * est)))

    x_in = x if s_pad == S else jnp.pad(x, ((0, 0), (0, s_pad - S), (0, 0)))

    bf = jnp.bfloat16
    wq, wk, wv, wo = (params[k].astype(bf) for k in ("wq", "wk", "wv", "wo"))
    w1, w2 = params["w1"].astype(bf), params["w2"].astype(bf)
    b1 = params["b1"].astype(jnp.float32)
    vecs = jnp.concatenate(
        [params[k] for k in ("bq", "bk", "bv", "bo", "b2",
                             "g1", "e1", "g2", "e2", "go", "eo")],
        axis=0).astype(jnp.float32)                               # (11, D)

    def const_spec(shape):
        nd = len(shape)
        index_map = lambda b, q, _nd=nd: (0,) * _nd
        if single_buffer:
            try:   # constant-index blocks: double-buffering only wastes VMEM
                return pl.BlockSpec(shape, index_map,
                                    pipeline_mode=pl.Buffered(1))
            except Exception:
                pass
        return pl.BlockSpec(shape, index_map)

    if hoist_kv:
        # K/V projection hoisted to XLA: removes the per-batch KV scratch and the
        # sequential dependence on the q-tile axis -> both grid axes parallel.
        xb = x_in.astype(bf)
        k_all = (jnp.einsum("bsd,de->bse", xb, wk,
                            preferred_element_type=jnp.float32)
                 + params["bk"][None]).astype(bf)
        v_all = (jnp.einsum("bsd,de->bse", xb, wv,
                            preferred_element_type=jnp.float32)
                 + params["bv"][None]).astype(bf)
        kernel = _make_hoisted_kv_kernel(nhead, head_dim, tq, s_pad, n_valid,
                                         exact_softmax)
        in_specs = [pl.BlockSpec((1, tq, D), lambda b, q: (b, q, 0)),
                    pl.BlockSpec((1, s_pad, D), lambda b, q: (b, 0, 0)),
                    pl.BlockSpec((1, s_pad, D), lambda b, q: (b, 0, 0)),
                    const_spec((D, D)), const_spec((D, D)),
                    const_spec((D, F)), const_spec((F, D)),
                    const_spec((1, F)), const_spec((_N_VEC, D))]
        args = (x_in, k_all, v_all, wq, wo, w1, w2, b1, vecs)
        scratch = [pltpu.VMEM((tq, D), jnp.float32)]              # ctx staging
        dim_sem = ("parallel", "parallel")
    else:
        kernel = _make_fused_kv_kernel(nhead, head_dim, tq, s_pad, n_valid,
                                       exact_softmax)
        in_specs = [pl.BlockSpec((1, s_pad, D), lambda b, q: (b, 0, 0)),
                    const_spec((D, D)), const_spec((D, D)),
                    const_spec((D, D)), const_spec((D, D)),
                    const_spec((D, F)), const_spec((F, D)),
                    const_spec((1, F)), const_spec((_N_VEC, D))]
        args = (x_in, wq, wk, wv, wo, w1, w2, b1, vecs)
        scratch = [pltpu.VMEM((s_pad, D), bf),                    # K (full seq)
                   pltpu.VMEM((s_pad, D), bf),                    # V (full seq)
                   pltpu.VMEM((tq, D), jnp.float32)]              # ctx staging
        dim_sem = ("parallel", "arbitrary")     # KV scratch reused across q-tiles

    out = pl.pallas_call(
        kernel,
        out_shape=jax.ShapeDtypeStruct((B, s_pad, D), x.dtype),
        grid_spec=pltpu.PrefetchScalarGridSpec(
            num_scalar_prefetch=0,
            grid=(B, n_qt),
            in_specs=in_specs,
            out_specs=pl.BlockSpec((1, tq, D), lambda b, q: (b, q, 0)),
            scratch_shapes=scratch),
        compiler_params=pltpu.CompilerParams(
            dimension_semantics=dim_sem,
            vmem_limit_bytes=vmem_limit),
    )(*args)
    return out if s_pad == S else out[:, :S, :]


def en_bi_transformer_layer(x, params, nhead, *, max_tq=None, hoist_kv=None,
                            exact_softmax=False):
    try:
        return _run(x, params, nhead, max_tq, hoist_kv, exact_softmax,
                    single_buffer=True)
    except Exception:
        # Fallback if this JAX build rejects pl.Buffered(1) single-buffering.
        return _run(x, params, nhead, max_tq, hoist_kv, exact_softmax,
                    single_buffer=False)


def init_params(key, d_model, nhead, dim_ff):
    # Fused-head layout: wq/wk/wv are (D, D) (per-head (D, Dh) concatenated along
    # the output axis); wo is (D, D) (per-head (Dh, D) stacked along the input
    # axis).  Head h occupies columns [h*Dh : (h+1)*Dh].  Large matmul weights
    # are bf16-representable (the precision the kernel feeds to the MXU).
    ks = jax.random.split(key, 12)

    def w(k, shape, scale=0.1):
        v = (scale * jax.random.normal(k, shape)).astype(jnp.float32)
        return v.astype(jnp.bfloat16).astype(jnp.float32)

    def b(k, shape, scale=0.02):
        return (scale * jax.random.normal(k, shape)).astype(jnp.float32)

    d, f = d_model, dim_ff
    return dict(
        wq=w(ks[0], (d, d)), bq=b(ks[1], (1, d)),
        wk=w(ks[2], (d, d)), bk=b(ks[3], (1, d)),
        wv=w(ks[4], (d, d)), bv=b(ks[5], (1, d)),
        wo=w(ks[6], (d, d)), bo=b(ks[7], (1, d)),
        w1=w(ks[8], (d, f)), b1=b(ks[9], (1, f)),
        w2=w(ks[10], (f, d)), b2=b(ks[11], (1, d)),
        g1=jnp.ones((1, d), jnp.float32), e1=jnp.zeros((1, d), jnp.float32),
        g2=jnp.ones((1, d), jnp.float32), e2=jnp.zeros((1, d), jnp.float32),
        go=jnp.ones((1, d), jnp.float32), eo=jnp.zeros((1, d), jnp.float32),
    )


def reference(x, p, nhead):
    B, S, D = x.shape
    dh = D // nhead
    scale = 1.0 / math.sqrt(dh)
    q = jnp.einsum("bsd,de->bse", x, p["wq"]) + p["bq"]
    k = jnp.einsum("bsd,de->bse", x, p["wk"]) + p["bk"]
    v = jnp.einsum("bsd,de->bse", x, p["wv"]) + p["bv"]
    qh = q.reshape(B, S, nhead, dh)
    kh = k.reshape(B, S, nhead, dh)
    vh = v.reshape(B, S, nhead, dh)
    s = jnp.einsum("bqhe,bkhe->bhqk", qh, kh) * scale
    pr = jax.nn.softmax(s, axis=-1)
    ctx = jnp.einsum("bhqk,bkhe->bqhe", pr, vh).reshape(B, S, D)
    attn = jnp.einsum("bse,ed->bsd", ctx, p["wo"]) + p["bo"]
    h1 = _layernorm(x + attn, p["g1"], p["e1"], 1e-5)
    ff = jnp.maximum(jnp.einsum("bsd,df->bsf", h1, p["w1"]) + p["b1"], 0.0)
    ff = jnp.einsum("bsf,fd->bsd", ff, p["w2"]) + p["b2"]
    h2 = _layernorm(h1 + ff, p["g2"], p["e2"], 1e-5)
    return x + _layernorm(h2, p["go"], p["eo"], 1e-6)


if __name__ == "__main__":
    B, S, D, H, F = 2, 8, 32, 4, 64
    key = jax.random.PRNGKey(0)
    kx, kx2, kp = jax.random.split(key, 3)
    x = jax.random.normal(kx, (B, S, D), dtype=jnp.float32)
    params = init_params(kp, D, H, F)

    tol = dict(rtol=3e-2, atol=3e-2)

    # 1) In-kernel (per-batch) K/V path, single q-tile.
    out = jax.block_until_ready(en_bi_transformer_layer(x, params, H))
    assert out.shape == (B, S, D)
    assert jnp.allclose(out, reference(x, params, H), **tol), "mismatch (fused KV)"

    # 2) Fused-KV path with multiple q-tiles and padded / masked keys.
    xr = jax.random.normal(kx2, (B, 12, D), dtype=jnp.float32)
    out2 = jax.block_until_ready(
        en_bi_transformer_layer(xr, params, H, max_tq=8, exact_softmax=True))
    assert out2.shape == (B, 12, D)
    assert jnp.allclose(out2, reference(xr, params, H), **tol), "mismatch (padded)"

    # 3) Small-batch path: K/V hoisted, both grid axes parallel.
    out3 = jax.block_until_ready(
        en_bi_transformer_layer(xr[:1], params, H, max_tq=8))
    assert out3.shape == (1, 12, D)
    assert jnp.allclose(out3, reference(xr[:1], params, H), **tol), \
        "mismatch (hoisted KV)"

    print("KERNEL_OK")
</pallas_src>

<mosaic_0001>
module attributes {stable_mosaic.version = 11 : i64} {
  func.func @kernel(%arg0: i32, %arg1: i32, %arg2: memref<1x8x32xf32, #tpu.memory_space<vmem>>, %arg3: memref<32x32xbf16, #tpu.memory_space<vmem>>, %arg4: memref<32x32xbf16, #tpu.memory_space<vmem>>, %arg5: memref<32x32xbf16, #tpu.memory_space<vmem>>, %arg6: memref<32x32xbf16, #tpu.memory_space<vmem>>, %arg7: memref<32x64xbf16, #tpu.memory_space<vmem>>, %arg8: memref<64x32xbf16, #tpu.memory_space<vmem>>, %arg9: memref<1x64xf32, #tpu.memory_space<vmem>>, %arg10: memref<11x32xf32, #tpu.memory_space<vmem>>, %arg11: memref<1x8x32xf32, #tpu.memory_space<vmem>>, %arg12: memref<8x32xbf16, #tpu.memory_space<vmem>>, %arg13: memref<8x32xbf16, #tpu.memory_space<vmem>>, %arg14: memref<8x32xf32, #tpu.memory_space<vmem>>) attributes {dimension_semantics = [#tpu.dimension_semantics<parallel>, #tpu.dimension_semantics<arbitrary>], iteration_bounds = array<i64: 2, 1>, scalar_prefetch = 0 : i64, scratch_operands = 3 : i64, tpu.core_type = #tpu.core_type<tc>, window_params = [{transform_indices = @transform_0, window_bounds = array<i64: 1, 8, 32>}, {pipeline_mode = #tpu.pipeline_mode<synchronous>, transform_indices = @transform_1, window_bounds = array<i64: 32, 32>}, {pipeline_mode = #tpu.pipeline_mode<synchronous>, transform_indices = @transform_2, window_bounds = array<i64: 32, 32>}, {pipeline_mode = #tpu.pipeline_mode<synchronous>, transform_indices = @transform_3, window_bounds = array<i64: 32, 32>}, {pipeline_mode = #tpu.pipeline_mode<synchronous>, transform_indices = @transform_4, window_bounds = array<i64: 32, 32>}, {pipeline_mode = #tpu.pipeline_mode<synchronous>, transform_indices = @transform_5, window_bounds = array<i64: 32, 64>}, {pipeline_mode = #tpu.pipeline_mode<synchronous>, transform_indices = @transform_6, window_bounds = array<i64: 64, 32>}, {pipeline_mode = #tpu.pipeline_mode<synchronous>, transform_indices = @transform_7, window_bounds = array<i64: 1, 64>}, {pipeline_mode = #tpu.pipeline_mode<synchronous>, transform_indices = @transform_8, window_bounds = array<i64: 11, 32>}, {transform_indices = @transform_9, window_bounds = array<i64: 1, 8, 32>}]} {
    %c0_i32 = arith.constant 0 : i32
    %0 = arith.cmpi eq, %arg1, %c0_i32 : i32
    %1 = arith.extui %0 : i1 to i32
    %c0_i32_0 = arith.constant 0 : i32
    %2 = arith.cmpi ne, %1, %c0_i32_0 : i32
    scf.if %2 {
      %c0_76 = arith.constant 0 : index
      %c0_77 = arith.constant 0 : index
      %c0_78 = arith.constant 0 : index
      %192 = vector.load %arg2[%c0_76, %c0_77, %c0_78] : memref<1x8x32xf32, #tpu.memory_space<vmem>>, vector<1x8x32xf32>
      %193 = vector.shape_cast %192 : vector<1x8x32xf32> to vector<8x32xf32>
      %194 = arith.truncf %193 : vector<8x32xf32> to vector<8x32xbf16>
      %c0_79 = arith.constant 0 : index
      %c0_80 = arith.constant 0 : index
      %195 = vector.load %arg4[%c0_79, %c0_80] : memref<32x32xbf16, #tpu.memory_space<vmem>>, vector<32x32xbf16>
      %cst_81 = arith.constant dense<0.000000e+00> : vector<8x32xf32>
      %196 = tpu.matmul %194, %195, %cst_81 {dimension_numbers = #tpu.dot_dimension_numbers<[1], [0], [0], [1], [0, 0, 1, 1], [], []>} : vector<8x32xbf16>, vector<32x32xbf16>, vector<8x32xf32> -> vector<8x32xf32>
      %c1 = arith.constant 1 : index
      %c0_82 = arith.constant 0 : index
      %197 = vector.load %arg10[%c1, %c0_82] : memref<11x32xf32, #tpu.memory_space<vmem>>, vector<1x32xf32>
      %198 = vector.broadcast %197 : vector<1x32xf32> to vector<8x32xf32>
      %199 = arith.addf %196, %198 : vector<8x32xf32>
      %c0_83 = arith.constant 0 : index
      %c0_84 = arith.constant 0 : index
      %200 = vector.load %arg5[%c0_83, %c0_84] : memref<32x32xbf16, #tpu.memory_space<vmem>>, vector<32x32xbf16>
      %cst_85 = arith.constant dense<0.000000e+00> : vector<8x32xf32>
      %201 = tpu.matmul %194, %200, %cst_85 {dimension_numbers = #tpu.dot_dimension_numbers<[1], [0], [0], [1], [0, 0, 1, 1], [], []>} : vector<8x32xbf16>, vector<32x32xbf16>, vector<8x32xf32> -> vector<8x32xf32>
      %c2 = arith.constant 2 : index
      %c0_86 = arith.constant 0 : index
      %202 = vector.load %arg10[%c2, %c0_86] : memref<11x32xf32, #tpu.memory_space<vmem>>, vector<1x32xf32>
      %203 = vector.broadcast %202 : vector<1x32xf32> to vector<8x32xf32>
      %204 = arith.addf %201, %203 : vector<8x32xf32>
      %205 = arith.truncf %199 : vector<8x32xf32> to vector<8x32xbf16>
      %c0_87 = arith.constant 0 : index
      %c0_88 = arith.constant 0 : index
      %206 = vector.load %arg12[%c0_87, %c0_88] : memref<8x32xbf16, #tpu.memory_space<vmem>>, vector<8x32xbf16>
      tpu.vector_store %arg12[%c0_87, %c0_88], %205 {strides = array<i32>} : memref<8x32xbf16, #tpu.memory_space<vmem>>, vector<8x32xbf16>,
      %207 = arith.truncf %204 : vector<8x32xf32> to vector<8x32xbf16>
      %c0_89 = arith.constant 0 : index
      %c0_90 = arith.constant 0 : index
      %208 = vector.load %arg13[%c0_89, %c0_90] : memref<8x32xbf16, #tpu.memory_space<vmem>>, vector<8x32xbf16>
      tpu.vector_store %arg13[%c0_89, %c0_90], %207 {strides = array<i32>} : memref<8x32xbf16, #tpu.memory_space<vmem>>, vector<8x32xbf16>,
    } else {
    }
    %c8_i32 = arith.constant 8 : i32
    %3 = arith.muli %arg1, %c8_i32 : i32
    %4 = tpu.assume_multiple %3, 8 : i32
    %c0 = arith.constant 0 : index
    %5 = arith.index_cast %4 : i32 to index
    %c0_1 = arith.constant 0 : index
    %6 = vector.load %arg2[%c0, %5, %c0_1] : memref<1x8x32xf32, #tpu.memory_space<vmem>>, vector<1x8x32xf32>
    %7 = vector.shape_cast %6 : vector<1x8x32xf32> to vector<8x32xf32>
    %8 = arith.truncf %7 : vector<8x32xf32> to vector<8x32xbf16>
    %c0_2 = arith.constant 0 : index
    %c0_3 = arith.constant 0 : index
    %9 = vector.load %arg3[%c0_2, %c0_3] : memref<32x32xbf16, #tpu.memory_space<vmem>>, vector<32x32xbf16>
    %cst = arith.constant dense<0.000000e+00> : vector<8x32xf32>
    %10 = tpu.matmul %8, %9, %cst {dimension_numbers = #tpu.dot_dimension_numbers<[1], [0], [0], [1], [0, 0, 1, 1], [], []>} : vector<8x32xbf16>, vector<32x32xbf16>, vector<8x32xf32> -> vector<8x32xf32>
    %c0_4 = arith.constant 0 : index
    %c0_5 = arith.constant 0 : index
    %11 = vector.load %arg10[%c0_4, %c0_5] : memref<11x32xf32, #tpu.memory_space<vmem>>, vector<1x32xf32>
    %12 = vector.broadcast %11 : vector<1x32xf32> to vector<8x32xf32>
    %13 = arith.addf %10, %12 : vector<8x32xf32>
    %cst_6 = arith.constant 0.353553385 : f32
    %14 = vector.broadcast %cst_6 : f32 to vector<8x32xf32>
    %15 = arith.mulf %13, %14 : vector<8x32xf32>
    %c0_7 = arith.constant 0 : index
    %c0_8 = arith.constant 0 : index
    %16 = vector.load %arg12[%c0_7, %c0_8] : memref<8x32xbf16, #tpu.memory_space<vmem>>, vector<8x32xbf16>
    %c0_9 = arith.constant 0 : index
    %c0_10 = arith.constant 0 : index
    %17 = vector.load %arg13[%c0_9, %c0_10] : memref<8x32xbf16, #tpu.memory_space<vmem>>, vector<8x32xbf16>
    %18 = arith.truncf %15 : vector<8x32xf32> to vector<8x32xbf16>
    %19 = vector.extract_strided_slice %18 {offsets = [0, 0], sizes = [8, 8], strides = [1, 1]} : vector<8x32xbf16> to vector<8x8xbf16>
    %20 = vector.extract_strided_slice %16 {offsets = [0, 0], sizes = [8, 8], strides = [1, 1]} : vector<8x32xbf16> to vector<8x8xbf16>
    %21 = vector.extract_strided_slice %17 {offsets = [0, 0], sizes = [8, 8], strides = [1, 1]} : vector<8x32xbf16> to vector<8x8xbf16>
    %cst_11 = arith.constant dense<0.000000e+00> : vector<8x8xf32>
    %22 = tpu.matmul %19, %20, %cst_11 {dimension_numbers = #tpu.dot_dimension_numbers<[1], [1], [0], [0], [0, 0, 1, 0], [], []>} : vector<8x8xbf16>, vector<8x8xbf16>, vector<8x8xf32> -> vector<8x8xf32>
    %cst_12 = arith.constant dense<0xFF800000> : vector<8xf32>
    %23 = vector.multi_reduction <maximumf>, %22, %cst_12 [1] : vector<8x8xf32> to vector<8xf32>
    %24 = vector.shape_cast %23 : vector<8xf32> to vector<8x1xf32>
    %25 = vector.broadcast %24 : vector<8x1xf32> to vector<8x8xf32>
    %26 = arith.subf %22, %25 : vector<8x8xf32>
    %27 = math.exp %26 : vector<8x8xf32>
    %cst_13 = arith.constant dense<0.000000e+00> : vector<8xf32>
    %28 = vector.multi_reduction <add>, %27, %cst_13 [1] : vector<8x8xf32> to vector<8xf32>
    %29 = vector.shape_cast %28 : vector<8xf32> to vector<8x1xf32>
    %30 = tpu.reciprocal %29 {approx = true} : vector<8x1xf32> -> vector<8x1xf32>
    %31 = vector.broadcast %30 : vector<8x1xf32> to vector<8x8xf32>
    %32 = arith.mulf %27, %31 : vector<8x8xf32>
    %33 = arith.truncf %32 : vector<8x8xf32> to vector<8x8xbf16>
    %cst_14 = arith.constant dense<0.000000e+00> : vector<8x8xf32>
    %34 = tpu.matmul %33, %21, %cst_14 {dimension_numbers = #tpu.dot_dimension_numbers<[1], [0], [0], [1], [0, 0, 1, 1], [], []>} : vector<8x8xbf16>, vector<8x8xbf16>, vector<8x8xf32> -> vector<8x8xf32>
    %c0_15 = arith.constant 0 : index
    %c0_16 = arith.constant 0 : index
    %35 = vector.load %arg14[%c0_15, %c0_16] : memref<8x32xf32, #tpu.memory_space<vmem>>, vector<8x8xf32>
    tpu.vector_store %arg14[%c0_15, %c0_16], %34 {strides = array<i32>} : memref<8x32xf32, #tpu.memory_space<vmem>>, vector<8x8xf32>,
    %36 = vector.extract_strided_slice %18 {offsets = [0, 8], sizes = [8, 8], strides = [1, 1]} : vector<8x32xbf16> to vector<8x8xbf16>
    %37 = vector.extract_strided_slice %16 {offsets = [0, 8], sizes = [8, 8], strides = [1, 1]} : vector<8x32xbf16> to vector<8x8xbf16>
    %38 = vector.extract_strided_slice %17 {offsets = [0, 8], sizes = [8, 8], strides = [1, 1]} : vector<8x32xbf16> to vector<8x8xbf16>
    %cst_17 = arith.constant dense<0.000000e+00> : vector<8x8xf32>
    %39 = tpu.matmul %36, %37, %cst_17 {dimension_numbers = #tpu.dot_dimension_numbers<[1], [1], [0], [0], [0, 0, 1, 0], [], []>} : vector<8x8xbf16>, vector<8x8xbf16>, vector<8x8xf32> -> vector<8x8xf32>
    %cst_18 = arith.constant dense<0xFF800000> : vector<8xf32>
    %40 = vector.multi_reduction <maximumf>, %39, %cst_18 [1] : vector<8x8xf32> to vector<8xf32>
    %41 = vector.shape_cast %40 : vector<8xf32> to vector<8x1xf32>
    %42 = vector.broadcast %41 : vector<8x1xf32> to vector<8x8xf32>
    %43 = arith.subf %39, %42 : vector<8x8xf32>
    %44 = math.exp %43 : vector<8x8xf32>
    %cst_19 = arith.constant dense<0.000000e+00> : vector<8xf32>
    %45 = vector.multi_reduction <add>, %44, %cst_19 [1] : vector<8x8xf32> to vector<8xf32>
    %46 = vector.shape_cast %45 : vector<8xf32> to vector<8x1xf32>
    %47 = tpu.reciprocal %46 {approx = true} : vector<8x1xf32> -> vector<8x1xf32>
    %48 = vector.broadcast %47 : vector<8x1xf32> to vector<8x8xf32>
    %49 = arith.mulf %44, %48 : vector<8x8xf32>
    %50 = arith.truncf %49 : vector<8x8xf32> to vector<8x8xbf16>
    %cst_20 = arith.constant dense<0.000000e+00> : vector<8x8xf32>
    %51 = tpu.matmul %50, %38, %cst_20 {dimension_numbers = #tpu.dot_dimension_numbers<[1], [0], [0], [1], [0, 0, 1, 1], [], []>} : vector<8x8xbf16>, vector<8x8xbf16>, vector<8x8xf32> -> vector<8x8xf32>
    %c0_21 = arith.constant 0 : index
    %c8 = arith.constant 8 : index
    %52 = vector.load %arg14[%c0_21, %c8] : memref<8x32xf32, #tpu.memory_space<vmem>>, vector<8x8xf32>
    tpu.vector_store %arg14[%c0_21, %c8], %51 {strides = array<i32>} : memref<8x32xf32, #tpu.memory_space<vmem>>, vector<8x8xf32>,
    %53 = vector.extract_strided_slice %18 {offsets = [0, 16], sizes = [8, 8], strides = [1, 1]} : vector<8x32xbf16> to vector<8x8xbf16>
    %54 = vector.extract_strided_slice %16 {offsets = [0, 16], sizes = [8, 8], strides = [1, 1]} : vector<8x32xbf16> to vector<8x8xbf16>
    %55 = vector.extract_strided_slice %17 {offsets = [0, 16], sizes = [8, 8], strides = [1, 1]} : vector<8x32xbf16> to vector<8x8xbf16>
    %cst_22 = arith.constant dense<0.000000e+00> : vector<8x8xf32>
    %56 = tpu.matmul %53, %54, %cst_22 {dimension_numbers = #tpu.dot_dimension_numbers<[1], [1], [0], [0], [0, 0, 1, 0], [], []>} : vector<8x8xbf16>, vector<8x8xbf16>, vector<8x8xf32> -> vector<8x8xf32>
    %cst_23 = arith.constant dense<0xFF800000> : vector<8xf32>
    %57 = vector.multi_reduction <maximumf>, %56, %cst_23 [1] : vector<8x8xf32> to vector<8xf32>
    %58 = vector.shape_cast %57 : vector<8xf32> to vector<8x1xf32>
    %59 = vector.broadcast %58 : vector<8x1xf32> to vector<8x8xf32>
    %60 = arith.subf %56, %59 : vector<8x8xf32>
    %61 = math.exp %60 : vector<8x8xf32>
    %cst_24 = arith.constant dense<0.000000e+00> : vector<8xf32>
    %62 = vector.multi_reduction <add>, %61, %cst_24 [1] : vector<8x8xf32> to vector<8xf32>
    %63 = vector.shape_cast %62 : vector<8xf32> to vector<8x1xf32>
    %64 = tpu.reciprocal %63 {approx = true} : vector<8x1xf32> -> vector<8x1xf32>
    %65 = vector.broadcast %64 : vector<8x1xf32> to vector<8x8xf32>
    %66 = arith.mulf %61, %65 : vector<8x8xf32>
    %67 = arith.truncf %66 : vector<8x8xf32> to vector<8x8xbf16>
    %cst_25 = arith.constant dense<0.000000e+00> : vector<8x8xf32>
    %68 = tpu.matmul %67, %55, %cst_25 {dimension_numbers = #tpu.dot_dimension_numbers<[1], [0], [0], [1], [0, 0, 1, 1], [], []>} : vector<8x8xbf16>, vector<8x8xbf16>, vector<8x8xf32> -> vector<8x8xf32>
    %c0_26 = arith.constant 0 : index
    %c16 = arith.constant 16 : index
    %69 = vector.load %arg14[%c0_26, %c16] : memref<8x32xf32, #tpu.memory_space<vmem>>, vector<8x8xf32>
    tpu.vector_store %arg14[%c0_26, %c16], %68 {strides = array<i32>} : memref<8x32xf32, #tpu.memory_space<vmem>>, vector<8x8xf32>,
    %70 = vector.extract_strided_slice %18 {offsets = [0, 24], sizes = [8, 8], strides = [1, 1]} : vector<8x32xbf16> to vector<8x8xbf16>
    %71 = vector.extract_strided_slice %16 {offsets = [0, 24], sizes = [8, 8], strides = [1, 1]} : vector<8x32xbf16> to vector<8x8xbf16>
    %72 = vector.extract_strided_slice %17 {offsets = [0, 24], sizes = [8, 8], strides = [1, 1]} : vector<8x32xbf16> to vector<8x8xbf16>
    %cst_27 = arith.constant dense<0.000000e+00> : vector<8x8xf32>
    %73 = tpu.matmul %70, %71, %cst_27 {dimension_numbers = #tpu.dot_dimension_numbers<[1], [1], [0], [0], [0, 0, 1, 0], [], []>} : vector<8x8xbf16>, vector<8x8xbf16>, vector<8x8xf32> -> vector<8x8xf32>
    %cst_28 = arith.constant dense<0xFF800000> : vector<8xf32>
    %74 = vector.multi_reduction <maximumf>, %73, %cst_28 [1] : vector<8x8xf32> to vector<8xf32>
    %75 = vector.shape_cast %74 : vector<8xf32> to vector<8x1xf32>
    %76 = vector.broadcast %75 : vector<8x1xf32> to vector<8x8xf32>
    %77 = arith.subf %73, %76 : vector<8x8xf32>
    %78 = math.exp %77 : vector<8x8xf32>
    %cst_29 = arith.constant dense<0.000000e+00> : vector<8xf32>
    %79 = vector.multi_reduction <add>, %78, %cst_29 [1] : vector<8x8xf32> to vector<8xf32>
    %80 = vector.shape_cast %79 : vector<8xf32> to vector<8x1xf32>
    %81 = tpu.reciprocal %80 {approx = true} : vector<8x1xf32> -> vector<8x1xf32>
    %82 = vector.broadcast %81 : vector<8x1xf32> to vector<8x8xf32>
    %83 = arith.mulf %78, %82 : vector<8x8xf32>
    %84 = arith.truncf %83 : vector<8x8xf32> to vector<8x8xbf16>
    %cst_30 = arith.constant dense<0.000000e+00> : vector<8x8xf32>
    %85 = tpu.matmul %84, %72, %cst_30 {dimension_numbers = #tpu.dot_dimension_numbers<[1], [0], [0], [1], [0, 0, 1, 1], [], []>} : vector<8x8xbf16>, vector<8x8xbf16>, vector<8x8xf32> -> vector<8x8xf32>
    %c0_31 = arith.constant 0 : index
    %c24 = arith.constant 24 : index
    %86 = vector.load %arg14[%c0_31, %c24] : memref<8x32xf32, #tpu.memory_space<vmem>>, vector<8x8xf32>
    tpu.vector_store %arg14[%c0_31, %c24], %85 {strides = array<i32>} : memref<8x32xf32, #tpu.memory_space<vmem>>, vector<8x8xf32>,
    %c0_32 = arith.constant 0 : index
    %c0_33 = arith.constant 0 : index
    %87 = vector.load %arg14[%c0_32, %c0_33] : memref<8x32xf32, #tpu.memory_space<vmem>>, vector<8x32xf32>
    %88 = arith.truncf %87 : vector<8x32xf32> to vector<8x32xbf16>
    %c0_34 = arith.constant 0 : index
    %c0_35 = arith.constant 0 : index
    %89 = vector.load %arg6[%c0_34, %c0_35] : memref<32x32xbf16, #tpu.memory_space<vmem>>, vector<32x32xbf16>
    %cst_36 = arith.constant dense<0.000000e+00> : vector<8x32xf32>
    %90 = tpu.matmul %88, %89, %cst_36 {dimension_numbers = #tpu.dot_dimension_numbers<[1], [0], [0], [1], [0, 0, 1, 1], [], []>} : vector<8x32xbf16>, vector<32x32xbf16>, vector<8x32xf32> -> vector<8x32xf32>
    %c3 = arith.constant 3 : index
    %c0_37 = arith.constant 0 : index
    %91 = vector.load %arg10[%c3, %c0_37] : memref<11x32xf32, #tpu.memory_space<vmem>>, vector<1x32xf32>
    %92 = vector.broadcast %91 : vector<1x32xf32> to vector<8x32xf32>
    %93 = arith.addf %90, %92 : vector<8x32xf32>
    %94 = arith.addf %7, %93 : vector<8x32xf32>
    %c5 = arith.constant 5 : index
    %c0_38 = arith.constant 0 : index
    %95 = vector.load %arg10[%c5, %c0_38] : memref<11x32xf32, #tpu.memory_space<vmem>>, vector<1x32xf32>
    %c6 = arith.constant 6 : index
    %c0_39 = arith.constant 0 : index
    %96 = vector.load %arg10[%c6, %c0_39] : memref<11x32xf32, #tpu.memory_space<vmem>>, vector<1x32xf32>
    %cst_40 = arith.constant dense<0.000000e+00> : vector<8xf32>
    %97 = vector.multi_reduction <add>, %94, %cst_40 [1] : vector<8x32xf32> to vector<8xf32>
    %98 = vector.shape_cast %97 : vector<8xf32> to vector<8x1xf32>
    %cst_41 = arith.constant 3.125000e-02 : f32
    %99 = vector.broadcast %cst_41 : f32 to vector<8x1xf32>
    %100 = arith.mulf %98, %99 : vector<8x1xf32>
    %101 = arith.mulf %94, %94 : vector<8x32xf32>
    %cst_42 = arith.constant dense<0.000000e+00> : vector<8xf32>
    %102 = vector.multi_reduction <add>, %101, %cst_42 [1] : vector<8x32xf32> to vector<8xf32>
    %103 = vector.shape_cast %102 : vector<8xf32> to vector<8x1xf32>
    %cst_43 = arith.constant 3.125000e-02 : f32
    %104 = vector.broadcast %cst_43 : f32 to vector<8x1xf32>
    %105 = arith.mulf %103, %104 : vector<8x1xf32>
    %106 = arith.mulf %100, %100 : vector<8x1xf32>
    %107 = arith.subf %105, %106 : vector<8x1xf32>
    %cst_44 = arith.constant 0.000000e+00 : f32
    %108 = vector.broadcast %cst_44 : f32 to vector<8x1xf32>
    %109 = arith.maximumf %107, %108 : vector<8x1xf32>
    %110 = vector.broadcast %100 : vector<8x1xf32> to vector<8x32xf32>
    %111 = arith.subf %94, %110 : vector<8x32xf32>
    %cst_45 = arith.constant 9.99999974E-6 : f32
    %112 = vector.broadcast %cst_45 : f32 to vector<8x1xf32>
    %113 = arith.addf %109, %112 : vector<8x1xf32>
    %114 = math.rsqrt %113 : vector<8x1xf32>
    %115 = vector.broadcast %114 : vector<8x1xf32> to vector<8x32xf32>
    %116 = arith.mulf %111, %115 : vector<8x32xf32>
    %117 = vector.broadcast %95 : vector<1x32xf32> to vector<8x32xf32>
    %118 = arith.mulf %116, %117 : vector<8x32xf32>
    %119 = vector.broadcast %96 : vector<1x32xf32> to vector<8x32xf32>
    %120 = arith.addf %118, %119 : vector<8x32xf32>
    %121 = arith.truncf %120 : vector<8x32xf32> to vector<8x32xbf16>
    %c0_46 = arith.constant 0 : index
    %c0_47 = arith.constant 0 : index
    %122 = vector.load %arg7[%c0_46, %c0_47] : memref<32x64xbf16, #tpu.memory_space<vmem>>, vector<32x64xbf16>
    %cst_48 = arith.constant dense<0.000000e+00> : vector<8x64xf32>
    %123 = tpu.matmul %121, %122, %cst_48 {dimension_numbers = #tpu.dot_dimension_numbers<[1], [0], [0], [1], [0, 0, 1, 1], [], []>} : vector<8x32xbf16>, vector<32x64xbf16>, vector<8x64xf32> -> vector<8x64xf32>
    %c0_49 = arith.constant 0 : index
    %c0_50 = arith.constant 0 : index
    %124 = vector.load %arg9[%c0_49, %c0_50] : memref<1x64xf32, #tpu.memory_space<vmem>>, vector<1x64xf32>
    %125 = vector.broadcast %124 : vector<1x64xf32> to vector<8x64xf32>
    %126 = arith.addf %123, %125 : vector<8x64xf32>
    %cst_51 = arith.constant 0.000000e+00 : f32
    %127 = vector.broadcast %cst_51 : f32 to vector<8x64xf32>
    %128 = arith.maximumf %126, %127 : vector<8x64xf32>
    %129 = arith.truncf %128 : vector<8x64xf32> to vector<8x64xbf16>
    %c0_52 = arith.constant 0 : index
    %c0_53 = arith.constant 0 : index
    %130 = vector.load %arg8[%c0_52, %c0_53] : memref<64x32xbf16, #tpu.memory_space<vmem>>, vector<64x32xbf16>
    %cst_54 = arith.constant dense<0.000000e+00> : vector<8x32xf32>
    %131 = tpu.matmul %129, %130, %cst_54 {dimension_numbers = #tpu.dot_dimension_numbers<[1], [0], [0], [1], [0, 0, 1, 1], [], []>} : vector<8x64xbf16>, vector<64x32xbf16>, vector<8x32xf32> -> vector<8x32xf32>
    %c4 = arith.constant 4 : index
    %c0_55 = arith.constant 0 : index
    %132 = vector.load %arg10[%c4, %c0_55] : memref<11x32xf32, #tpu.memory_space<vmem>>, vector<1x32xf32>
    %133 = vector.broadcast %132 : vector<1x32xf32> to vector<8x32xf32>
    %134 = arith.addf %131, %133 : vector<8x32xf32>
    %135 = arith.addf %120, %134 : vector<8x32xf32>
    %c7 = arith.constant 7 : index
    %c0_56 = arith.constant 0 : index
    %136 = vector.load %arg10[%c7, %c0_56] : memref<11x32xf32, #tpu.memory_space<vmem>>, vector<1x32xf32>
    %c8_57 = arith.constant 8 : index
    %c0_58 = arith.constant 0 : index
    %137 = vector.load %arg10[%c8_57, %c0_58] : memref<11x32xf32, #tpu.memory_space<vmem>>, vector<1x32xf32>
    %cst_59 = arith.constant dense<0.000000e+00> : vector<8xf32>
    %138 = vector.multi_reduction <add>, %135, %cst_59 [1] : vector<8x32xf32> to vector<8xf32>
    %139 = vector.shape_cast %138 : vector<8xf32> to vector<8x1xf32>
    %cst_60 = arith.constant 3.125000e-02 : f32
    %140 = vector.broadcast %cst_60 : f32 to vector<8x1xf32>
    %141 = arith.mulf %139, %140 : vector<8x1xf32>
    %142 = arith.mulf %135, %135 : vector<8x32xf32>
    %cst_61 = arith.constant dense<0.000000e+00> : vector<8xf32>
    %143 = vector.multi_reduction <add>, %142, %cst_61 [1] : vector<8x32xf32> to vector<8xf32>
    %144 = vector.shape_cast %143 : vector<8xf32> to vector<8x1xf32>
    %cst_62 = arith.constant 3.125000e-02 : f32
    %145 = vector.broadcast %cst_62 : f32 to vector<8x1xf32>
    %146 = arith.mulf %144, %145 : vector<8x1xf32>
    %147 = arith.mulf %141, %141 : vector<8x1xf32>
    %148 = arith.subf %146, %147 : vector<8x1xf32>
    %cst_63 = arith.constant 0.000000e+00 : f32
    %149 = vector.broadcast %cst_63 : f32 to vector<8x1xf32>
    %150 = arith.maximumf %148, %149 : vector<8x1xf32>
    %151 = vector.broadcast %141 : vector<8x1xf32> to vector<8x32xf32>
    %152 = arith.subf %135, %151 : vector<8x32xf32>
    %cst_64 = arith.constant 9.99999974E-6 : f32
    %153 = vector.broadcast %cst_64 : f32 to vector<8x1xf32>
    %154 = arith.addf %150, %153 : vector<8x1xf32>
    %155 = math.rsqrt %154 : vector<8x1xf32>
    %156 = vector.broadcast %155 : vector<8x1xf32> to vector<8x32xf32>
    %157 = arith.mulf %152, %156 : vector<8x32xf32>
    %158 = vector.broadcast %136 : vector<1x32xf32> to vector<8x32xf32>
    %159 = arith.mulf %157, %158 : vector<8x32xf32>
    %160 = vector.broadcast %137 : vector<1x32xf32> to vector<8x32xf32>
    %161 = arith.addf %159, %160 : vector<8x32xf32>
    %c9 = arith.constant 9 : index
    %c0_65 = arith.constant 0 : index
    %162 = vector.load %arg10[%c9, %c0_65] : memref<11x32xf32, #tpu.memory_space<vmem>>, vector<1x32xf32>
    %c10 = arith.constant 10 : index
    %c0_66 = arith.constant 0 : index
    %163 = vector.load %arg10[%c10, %c0_66] : memref<11x32xf32, #tpu.memory_space<vmem>>, vector<1x32xf32>
    %cst_67 = arith.constant dense<0.000000e+00> : vector<8xf32>
    %164 = vector.multi_reduction <add>, %161, %cst_67 [1] : vector<8x32xf32> to vector<8xf32>
    %165 = vector.shape_cast %164 : vector<8xf32> to vector<8x1xf32>
    %cst_68 = arith.constant 3.125000e-02 : f32
    %166 = vector.broadcast %cst_68 : f32 to vector<8x1xf32>
    %167 = arith.mulf %165, %166 : vector<8x1xf32>
    %168 = arith.mulf %161, %161 : vector<8x32xf32>
    %cst_69 = arith.constant dense<0.000000e+00> : vector<8xf32>
    %169 = vector.multi_reduction <add>, %168, %cst_69 [1] : vector<8x32xf32> to vector<8xf32>
    %170 = vector.shape_cast %169 : vector<8xf32> to vector<8x1xf32>
    %cst_70 = arith.constant 3.125000e-02 : f32
    %171 = vector.broadcast %cst_70 : f32 to vector<8x1xf32>
    %172 = arith.mulf %170, %171 : vector<8x1xf32>
    %173 = arith.mulf %167, %167 : vector<8x1xf32>
    %174 = arith.subf %172, %173 : vector<8x1xf32>
    %cst_71 = arith.constant 0.000000e+00 : f32
    %175 = vector.broadcast %cst_71 : f32 to vector<8x1xf32>
    %176 = arith.maximumf %174, %175 : vector<8x1xf32>
    %177 = vector.broadcast %167 : vector<8x1xf32> to vector<8x32xf32>
    %178 = arith.subf %161, %177 : vector<8x32xf32>
    %cst_72 = arith.constant 9.99999997E-7 : f32
    %179 = vector.broadcast %cst_72 : f32 to vector<8x1xf32>
    %180 = arith.addf %176, %179 : vector<8x1xf32>
    %181 = math.rsqrt %180 : vector<8x1xf32>
    %182 = vector.broadcast %181 : vector<8x1xf32> to vector<8x32xf32>
    %183 = arith.mulf %178, %182 : vector<8x32xf32>
    %184 = vector.broadcast %162 : vector<1x32xf32> to vector<8x32xf32>
    %185 = arith.mulf %183, %184 : vector<8x32xf32>
    %186 = vector.broadcast %163 : vector<1x32xf32> to vector<8x32xf32>
    %187 = arith.addf %185, %186 : vector<8x32xf32>
    %188 = arith.addf %7, %187 : vector<8x32xf32>
    %c0_73 = arith.constant 0 : index
    %c0_74 = arith.constant 0 : index
    %c0_75 = arith.constant 0 : index
    %189 = vector.load %arg11[%c0_73, %c0_74, %c0_75] : memref<1x8x32xf32, #tpu.memory_space<vmem>>, vector<1x8x32xf32>
    %190 = vector.shape_cast %189 : vector<1x8x32xf32> to vector<8x32xf32>
    %191 = vector.shape_cast %188 : vector<8x32xf32> to vector<1x8x32xf32>
    tpu.vector_store %arg11[%c0_73, %c0_74, %c0_75], %191 {strides = array<i32>} : memref<1x8x32xf32, #tpu.memory_space<vmem>>, vector<1x8x32xf32>,
    return
  }
  func.func @transform_0(%arg0: i32, %arg1: i32) -> (i32, i32, i32) {
    %c0_i32 = arith.constant 0 : i32
    %c0_i32_0 = arith.constant 0 : i32
    %c0_i32_1 = arith.constant 0 : i32
    return %arg0, %c0_i32, %c0_i32_0 : i32, i32, i32
  }
  func.func @transform_1(%arg0: i32, %arg1: i32) -> (i32, i32) {
    %c0_i32 = arith.constant 0 : i32
    %c0_i32_0 = arith.constant 0 : i32
    %c0_i32_1 = arith.constant 0 : i32
    return %c0_i32, %c0_i32_0 : i32, i32
  }
  func.func @transform_2(%arg0: i32, %arg1: i32) -> (i32, i32) {
    %c0_i32 = arith.constant 0 : i32
    %c0_i32_0 = arith.constant 0 : i32
    %c0_i32_1 = arith.constant 0 : i32
    return %c0_i32, %c0_i32_0 : i32, i32
  }
  func.func @transform_3(%arg0: i32, %arg1: i32) -> (i32, i32) {
    %c0_i32 = arith.constant 0 : i32
    %c0_i32_0 = arith.constant 0 : i32
    %c0_i32_1 = arith.constant 0 : i32
    return %c0_i32, %c0_i32_0 : i32, i32
  }
  func.func @transform_4(%arg0: i32, %arg1: i32) -> (i32, i32) {
    %c0_i32 = arith.constant 0 : i32
    %c0_i32_0 = arith.constant 0 : i32
    %c0_i32_1 = arith.constant 0 : i32
    return %c0_i32, %c0_i32_0 : i32, i32
  }
  func.func @transform_5(%arg0: i32, %arg1: i32) -> (i32, i32) {
    %c0_i32 = arith.constant 0 : i32
    %c0_i32_0 = arith.constant 0 : i32
    %c0_i32_1 = arith.constant 0 : i32
    return %c0_i32, %c0_i32_0 : i32, i32
  }
  func.func @transform_6(%arg0: i32, %arg1: i32) -> (i32, i32) {
    %c0_i32 = arith.constant 0 : i32
    %c0_i32_0 = arith.constant 0 : i32
    %c0_i32_1 = arith.constant 0 : i32
    return %c0_i32, %c0_i32_0 : i32, i32
  }
  func.func @transform_7(%arg0: i32, %arg1: i32) -> (i32, i32) {
    %c0_i32 = arith.constant 0 : i32
    %c0_i32_0 = arith.constant 0 : i32
    %c0_i32_1 = arith.constant 0 : i32
    return %c0_i32, %c0_i32_0 : i32, i32
  }
  func.func @transform_8(%arg0: i32, %arg1: i32) -> (i32, i32) {
    %c0_i32 = arith.constant 0 : i32
    %c0_i32_0 = arith.constant 0 : i32
    %c0_i32_1 = arith.constant 0 : i32
    return %c0_i32, %c0_i32_0 : i32, i32
  }
  func.func @transform_9(%arg0: i32, %arg1: i32) -> (i32, i32, i32) {
    %c0_i32 = arith.constant 0 : i32
    %c0_i32_0 = arith.constant 0 : i32
    return %arg0, %arg1, %c0_i32 : i32, i32, i32
  }
}

module attributes {stable_mosaic.version = 11 : i64} {
  func.func @kernel(%arg0: i32, %arg1: i32, %arg2: memref<1x8x32xf32, #tpu.memory_space<vmem>>, %arg3: memref<32x32xbf16, #tpu.memory_space<vmem>>, %arg4: memref<32x32xbf16, #tpu.memory_space<vmem>>, %arg5: memref<32x32xbf16, #tpu.memory_space<vmem>>, %arg6: memref<32x32xbf16, #tpu.memory_space<vmem>>, %arg7: memref<32x64xbf16, #tpu.memory_space<vmem>>, %arg8: memref<64x32xbf16, #tpu.memory_space<vmem>>, %arg9: memref<1x64xf32, #tpu.memory_space<vmem>>, %arg10: memref<11x32xf32, #tpu.memory_space<vmem>>, %arg11: memref<1x8x32xf32, #tpu.memory_space<vmem>>, %arg12: memref<8x32xbf16, #tpu.memory_space<vmem>>, %arg13: memref<8x32xbf16, #tpu.memory_space<vmem>>, %arg14: memref<8x32xf32, #tpu.memory_space<vmem>>) attributes {dimension_semantics = [#tpu.dimension_semantics<parallel>, #tpu.dimension_semantics<arbitrary>], iteration_bounds = array<i64: 2, 1>, scalar_prefetch = 0 : i64, scratch_operands = 3 : i64, tpu.core_type = #tpu.core_type<tc>, window_params = [{transform_indices = @transform_0, window_bounds = array<i64: 1, 8, 32>}, {pipeline_mode = #tpu.pipeline_mode<synchronous>, transform_indices = @transform_1, window_bounds = array<i64: 32, 32>}, {pipeline_mode = #tpu.pipeline_mode<synchronous>, transform_indices = @transform_2, window_bounds = array<i64: 32, 32>}, {pipeline_mode = #tpu.pipeline_mode<synchronous>, transform_indices = @transform_3, window_bounds = array<i64: 32, 32>}, {pipeline_mode = #tpu.pipeline_mode<synchronous>, transform_indices = @transform_4, window_bounds = array<i64: 32, 32>}, {pipeline_mode = #tpu.pipeline_mode<synchronous>, transform_indices = @transform_5, window_bounds = array<i64: 32, 64>}, {pipeline_mode = #tpu.pipeline_mode<synchronous>, transform_indices = @transform_6, window_bounds = array<i64: 64, 32>}, {pipeline_mode = #tpu.pipeline_mode<synchronous>, transform_indices = @transform_7, window_bounds = array<i64: 1, 64>}, {pipeline_mode = #tpu.pipeline_mode<synchronous>, transform_indices = @transform_8, window_bounds = array<i64: 11, 32>}, {transform_indices = @transform_9, window_bounds = array<i64: 1, 8, 32>}]} {
    %c0_i32 = arith.constant 0 : i32
    %0 = arith.cmpi eq, %arg1, %c0_i32 : i32
    %1 = arith.extui %0 : i1 to i32
    %c0_i32_0 = arith.constant 0 : i32
    %2 = arith.cmpi ne, %1, %c0_i32_0 : i32
    scf.if %2 {
      %c0_76 = arith.constant 0 : index
      %c0_77 = arith.constant 0 : index
      %c0_78 = arith.constant 0 : index
      %192 = vector.load %arg2[%c0_76, %c0_77, %c0_78] : memref<1x8x32xf32, #tpu.memory_space<vmem>>, vector<1x8x32xf32>
      %193 = vector.shape_cast %192 : vector<1x8x32xf32> to vector<8x32xf32>
      %194 = arith.truncf %193 : vector<8x32xf32> to vector<8x32xbf16>
      %c0_79 = arith.constant 0 : index
      %c0_80 = arith.constant 0 : index
      %195 = vector.load %arg4[%c0_79, %c0_80] : memref<32x32xbf16, #tpu.memory_space<vmem>>, vector<32x32xbf16>
      %cst_81 = arith.constant dense<0.000000e+00> : vector<8x32xf32>
      %196 = tpu.matmul %194, %195, %cst_81 {dimension_numbers = #tpu.dot_dimension_numbers<[1], [0], [0], [1], [0, 0, 1, 1], [], []>} : vector<8x32xbf16>, vector<32x32xbf16>, vector<8x32xf32> -> vector<8x32xf32>
      %c1 = arith.constant 1 : index
      %c0_82 = arith.constant 0 : index
      %197 = vector.load %arg10[%c1, %c0_82] : memref<11x32xf32, #tpu.memory_space<vmem>>, vector<1x32xf32>
      %198 = vector.broadcast %197 : vector<1x32xf32> to vector<8x32xf32>
      %199 = arith.addf %196, %198 : vector<8x32xf32>
      %c0_83 = arith.constant 0 : index
      %c0_84 = arith.constant 0 : index
      %200 = vector.load %arg5[%c0_83, %c0_84] : memref<32x32xbf16, #tpu.memory_space<vmem>>, vector<32x32xbf16>
      %cst_85 = arith.constant dense<0.000000e+00> : vector<8x32xf32>
      %201 = tpu.matmul %194, %200, %cst_85 {dimension_numbers = #tpu.dot_dimension_numbers<[1], [0], [0], [1], [0, 0, 1, 1], [], []>} : vector<8x32xbf16>, vector<32x32xbf16>, vector<8x32xf32> -> vector<8x32xf32>
      %c2 = arith.constant 2 : index
      %c0_86 = arith.constant 0 : index
      %202 = vector.load %arg10[%c2, %c0_86] : memref<11x32xf32, #tpu.memory_space<vmem>>, vector<1x32xf32>
      %203 = vector.broadcast %202 : vector<1x32xf32> to vector<8x32xf32>
      %204 = arith.addf %201, %203 : vector<8x32xf32>
      %205 = arith.truncf %199 : vector<8x32xf32> to vector<8x32xbf16>
      %c0_87 = arith.constant 0 : index
      %c0_88 = arith.constant 0 : index
      %206 = vector.load %arg12[%c0_87, %c0_88] : memref<8x32xbf16, #tpu.memory_space<vmem>>, vector<8x32xbf16>
      tpu.vector_store %arg12[%c0_87, %c0_88], %205 {strides = array<i32>} : memref<8x32xbf16, #tpu.memory_space<vmem>>, vector<8x32xbf16>,
      %207 = arith.truncf %204 : vector<8x32xf32> to vector<8x32xbf16>
      %c0_89 = arith.constant 0 : index
      %c0_90 = arith.constant 0 : index
      %208 = vector.load %arg13[%c0_89, %c0_90] : memref<8x32xbf16, #tpu.memory_space<vmem>>, vector<8x32xbf16>
      tpu.vector_store %arg13[%c0_89, %c0_90], %207 {strides = array<i32>} : memref<8x32xbf16, #tpu.memory_space<vmem>>, vector<8x32xbf16>,
    } else {
    }
    %c8_i32 = arith.constant 8 : i32
    %3 = arith.muli %arg1, %c8_i32 : i32
    %4 = tpu.assume_multiple %3, 8 : i32
    %c0 = arith.constant 0 : index
    %5 = arith.index_cast %4 : i32 to index
    %c0_1 = arith.constant 0 : index
    %6 = vector.load %arg2[%c0, %5, %c0_1] : memref<1x8x32xf32, #tpu.memory_space<vmem>>, vector<1x8x32xf32>
    %7 = vector.shape_cast %6 : vector<1x8x32xf32> to vector<8x32xf32>
    %8 = arith.truncf %7 : vector<8x32xf32> to vector<8x32xbf16>
    %c0_2 = arith.constant 0 : index
    %c0_3 = arith.constant 0 : index
    %9 = vector.load %arg3[%c0_2, %c0_3] : memref<32x32xbf16, #tpu.memory_space<vmem>>, vector<32x32xbf16>
    %cst = arith.constant dense<0.000000e+00> : vector<8x32xf32>
    %10 = tpu.matmul %8, %9, %cst {dimension_numbers = #tpu.dot_dimension_numbers<[1], [0], [0], [1], [0, 0, 1, 1], [], []>} : vector<8x32xbf16>, vector<32x32xbf16>, vector<8x32xf32> -> vector<8x32xf32>
    %c0_4 = arith.constant 0 : index
    %c0_5 = arith.constant 0 : index
    %11 = vector.load %arg10[%c0_4, %c0_5] : memref<11x32xf32, #tpu.memory_space<vmem>>, vector<1x32xf32>
    %12 = vector.broadcast %11 : vector<1x32xf32> to vector<8x32xf32>
    %13 = arith.addf %10, %12 : vector<8x32xf32>
    %cst_6 = arith.constant 0.353553385 : f32
    %14 = vector.broadcast %cst_6 : f32 to vector<8x32xf32>
    %15 = arith.mulf %13, %14 : vector<8x32xf32>
    %c0_7 = arith.constant 0 : index
    %c0_8 = arith.constant 0 : index
    %16 = vector.load %arg12[%c0_7, %c0_8] : memref<8x32xbf16, #tpu.memory_space<vmem>>, vector<8x32xbf16>
    %c0_9 = arith.constant 0 : index
    %c0_10 = arith.constant 0 : index
    %17 = vector.load %arg13[%c0_9, %c0_10] : memref<8x32xbf16, #tpu.memory_space<vmem>>, vector<8x32xbf16>
    %18 = arith.truncf %15 : vector<8x32xf32> to vector<8x32xbf16>
    %19 = vector.extract_strided_slice %18 {offsets = [0, 0], sizes = [8, 8], strides = [1, 1]} : vector<8x32xbf16> to vector<8x8xbf16>
    %20 = vector.extract_strided_slice %16 {offsets = [0, 0], sizes = [8, 8], strides = [1, 1]} : vector<8x32xbf16> to vector<8x8xbf16>
    %21 = vector.extract_strided_slice %17 {offsets = [0, 0], sizes = [8, 8], strides = [1, 1]} : vector<8x32xbf16> to vector<8x8xbf16>
    %cst_11 = arith.constant dense<0.000000e+00> : vector<8x8xf32>
    %22 = tpu.matmul %19, %20, %cst_11 {dimension_numbers = #tpu.dot_dimension_numbers<[1], [1], [0], [0], [0, 0, 1, 0], [], []>} : vector<8x8xbf16>, vector<8x8xbf16>, vector<8x8xf32> -> vector<8x8xf32>
    %cst_12 = arith.constant dense<0xFF800000> : vector<8xf32>
    %23 = vector.multi_reduction <maximumf>, %22, %cst_12 [1] : vector<8x8xf32> to vector<8xf32>
    %24 = vector.shape_cast %23 : vector<8xf32> to vector<8x1xf32>
    %25 = vector.broadcast %24 : vector<8x1xf32> to vector<8x8xf32>
    %26 = arith.subf %22, %25 : vector<8x8xf32>
    %27 = math.exp %26 : vector<8x8xf32>
    %cst_13 = arith.constant dense<0.000000e+00> : vector<8xf32>
    %28 = vector.multi_reduction <add>, %27, %cst_13 [1] : vector<8x8xf32> to vector<8xf32>
    %29 = vector.shape_cast %28 : vector<8xf32> to vector<8x1xf32>
    %30 = tpu.reciprocal %29 {approx = true} : vector<8x1xf32> -> vector<8x1xf32>
    %31 = vector.broadcast %30 : vector<8x1xf32> to vector<8x8xf32>
    %32 = arith.mulf %27, %31 : vector<8x8xf32>
    %33 = arith.truncf %32 : vector<8x8xf32> to vector<8x8xbf16>
    %cst_14 = arith.constant dense<0.000000e+00> : vector<8x8xf32>
    %34 = tpu.matmul %33, %21, %cst_14 {dimension_numbers = #tpu.dot_dimension_numbers<[1], [0], [0], [1], [0, 0, 1, 1], [], []>} : vector<8x8xbf16>, vector<8x8xbf16>, vector<8x8xf32> -> vector<8x8xf32>
    %c0_15 = arith.constant 0 : index
    %c0_16 = arith.constant 0 : index
    %35 = vector.load %arg14[%c0_15, %c0_16] : memref<8x32xf32, #tpu.memory_space<vmem>>, vector<8x8xf32>
    tpu.vector_store %arg14[%c0_15, %c0_16], %34 {strides = array<i32>} : memref<8x32xf32, #tpu.memory_space<vmem>>, vector<8x8xf32>,
    %36 = vector.extract_strided_slice %18 {offsets = [0, 8], sizes = [8, 8], strides = [1, 1]} : vector<8x32xbf16> to vector<8x8xbf16>
    %37 = vector.extract_strided_slice %16 {offsets = [0, 8], sizes = [8, 8], strides = [1, 1]} : vector<8x32xbf16> to vector<8x8xbf16>
    %38 = vector.extract_strided_slice %17 {offsets = [0, 8], sizes = [8, 8], strides = [1, 1]} : vector<8x32xbf16> to vector<8x8xbf16>
    %cst_17 = arith.constant dense<0.000000e+00> : vector<8x8xf32>
    %39 = tpu.matmul %36, %37, %cst_17 {dimension_numbers = #tpu.dot_dimension_numbers<[1], [1], [0], [0], [0, 0, 1, 0], [], []>} : vector<8x8xbf16>, vector<8x8xbf16>, vector<8x8xf32> -> vector<8x8xf32>
    %cst_18 = arith.constant dense<0xFF800000> : vector<8xf32>
    %40 = vector.multi_reduction <maximumf>, %39, %cst_18 [1] : vector<8x8xf32> to vector<8xf32>
    %41 = vector.shape_cast %40 : vector<8xf32> to vector<8x1xf32>
    %42 = vector.broadcast %41 : vector<8x1xf32> to vector<8x8xf32>
    %43 = arith.subf %39, %42 : vector<8x8xf32>
    %44 = math.exp %43 : vector<8x8xf32>
    %cst_19 = arith.constant dense<0.000000e+00> : vector<8xf32>
    %45 = vector.multi_reduction <add>, %44, %cst_19 [1] : vector<8x8xf32> to vector<8xf32>
    %46 = vector.shape_cast %45 : vector<8xf32> to vector<8x1xf32>
    %47 = tpu.reciprocal %46 {approx = true} : vector<8x1xf32> -> vector<8x1xf32>
    %48 = vector.broadcast %47 : vector<8x1xf32> to vector<8x8xf32>
    %49 = arith.mulf %44, %48 : vector<8x8xf32>
    %50 = arith.truncf %49 : vector<8x8xf32> to vector<8x8xbf16>
    %cst_20 = arith.constant dense<0.000000e+00> : vector<8x8xf32>
    %51 = tpu.matmul %50, %38, %cst_20 {dimension_numbers = #tpu.dot_dimension_numbers<[1], [0], [0], [1], [0, 0, 1, 1], [], []>} : vector<8x8xbf16>, vector<8x8xbf16>, vector<8x8xf32> -> vector<8x8xf32>
    %c0_21 = arith.constant 0 : index
    %c8 = arith.constant 8 : index
    %52 = vector.load %arg14[%c0_21, %c8] : memref<8x32xf32, #tpu.memory_space<vmem>>, vector<8x8xf32>
    tpu.vector_store %arg14[%c0_21, %c8], %51 {strides = array<i32>} : memref<8x32xf32, #tpu.memory_space<vmem>>, vector<8x8xf32>,
    %53 = vector.extract_strided_slice %18 {offsets = [0, 16], sizes = [8, 8], strides = [1, 1]} : vector<8x32xbf16> to vector<8x8xbf16>
    %54 = vector.extract_strided_slice %16 {offsets = [0, 16], sizes = [8, 8], strides = [1, 1]} : vector<8x32xbf16> to vector<8x8xbf16>
    %55 = vector.extract_strided_slice %17 {offsets = [0, 16], sizes = [8, 8], strides = [1, 1]} : vector<8x32xbf16> to vector<8x8xbf16>
    %cst_22 = arith.constant dense<0.000000e+00> : vector<8x8xf32>
    %56 = tpu.matmul %53, %54, %cst_22 {dimension_numbers = #tpu.dot_dimension_numbers<[1], [1], [0], [0], [0, 0, 1, 0], [], []>} : vector<8x8xbf16>, vector<8x8xbf16>, vector<8x8xf32> -> vector<8x8xf32>
    %cst_23 = arith.constant dense<0xFF800000> : vector<8xf32>
    %57 = vector.multi_reduction <maximumf>, %56, %cst_23 [1] : vector<8x8xf32> to vector<8xf32>
    %58 = vector.shape_cast %57 : vector<8xf32> to vector<8x1xf32>
    %59 = vector.broadcast %58 : vector<8x1xf32> to vector<8x8xf32>
    %60 = arith.subf %56, %59 : vector<8x8xf32>
    %61 = math.exp %60 : vector<8x8xf32>
    %cst_24 = arith.constant dense<0.000000e+00> : vector<8xf32>
    %62 = vector.multi_reduction <add>, %61, %cst_24 [1] : vector<8x8xf32> to vector<8xf32>
    %63 = vector.shape_cast %62 : vector<8xf32> to vector<8x1xf32>
    %64 = tpu.reciprocal %63 {approx = true} : vector<8x1xf32> -> vector<8x1xf32>
    %65 = vector.broadcast %64 : vector<8x1xf32> to vector<8x8xf32>
    %66 = arith.mulf %61, %65 : vector<8x8xf32>
    %67 = arith.truncf %66 : vector<8x8xf32> to vector<8x8xbf16>
    %cst_25 = arith.constant dense<0.000000e+00> : vector<8x8xf32>
    %68 = tpu.matmul %67, %55, %cst_25 {dimension_numbers = #tpu.dot_dimension_numbers<[1], [0], [0], [1], [0, 0, 1, 1], [], []>} : vector<8x8xbf16>, vector<8x8xbf16>, vector<8x8xf32> -> vector<8x8xf32>
    %c0_26 = arith.constant 0 : index
    %c16 = arith.constant 16 : index
    %69 = vector.load %arg14[%c0_26, %c16] : memref<8x32xf32, #tpu.memory_space<vmem>>, vector<8x8xf32>
    tpu.vector_store %arg14[%c0_26, %c16], %68 {strides = array<i32>} : memref<8x32xf32, #tpu.memory_space<vmem>>, vector<8x8xf32>,
    %70 = vector.extract_strided_slice %18 {offsets = [0, 24], sizes = [8, 8], strides = [1, 1]} : vector<8x32xbf16> to vector<8x8xbf16>
    %71 = vector.extract_strided_slice %16 {offsets = [0, 24], sizes = [8, 8], strides = [1, 1]} : vector<8x32xbf16> to vector<8x8xbf16>
    %72 = vector.extract_strided_slice %17 {offsets = [0, 24], sizes = [8, 8], strides = [1, 1]} : vector<8x32xbf16> to vector<8x8xbf16>
    %cst_27 = arith.constant dense<0.000000e+00> : vector<8x8xf32>
    %73 = tpu.matmul %70, %71, %cst_27 {dimension_numbers = #tpu.dot_dimension_numbers<[1], [1], [0], [0], [0, 0, 1, 0], [], []>} : vector<8x8xbf16>, vector<8x8xbf16>, vector<8x8xf32> -> vector<8x8xf32>
    %cst_28 = arith.constant dense<0xFF800000> : vector<8xf32>
    %74 = vector.multi_reduction <maximumf>, %73, %cst_28 [1] : vector<8x8xf32> to vector<8xf32>
    %75 = vector.shape_cast %74 : vector<8xf32> to vector<8x1xf32>
    %76 = vector.broadcast %75 : vector<8x1xf32> to vector<8x8xf32>
    %77 = arith.subf %73, %76 : vector<8x8xf32>
    %78 = math.exp %77 : vector<8x8xf32>
    %cst_29 = arith.constant dense<0.000000e+00> : vector<8xf32>
    %79 = vector.multi_reduction <add>, %78, %cst_29 [1] : vector<8x8xf32> to vector<8xf32>
    %80 = vector.shape_cast %79 : vector<8xf32> to vector<8x1xf32>
    %81 = tpu.reciprocal %80 {approx = true} : vector<8x1xf32> -> vector<8x1xf32>
    %82 = vector.broadcast %81 : vector<8x1xf32> to vector<8x8xf32>
    %83 = arith.mulf %78, %82 : vector<8x8xf32>
    %84 = arith.truncf %83 : vector<8x8xf32> to vector<8x8xbf16>
    %cst_30 = arith.constant dense<0.000000e+00> : vector<8x8xf32>
    %85 = tpu.matmul %84, %72, %cst_30 {dimension_numbers = #tpu.dot_dimension_numbers<[1], [0], [0], [1], [0, 0, 1, 1], [], []>} : vector<8x8xbf16>, vector<8x8xbf16>, vector<8x8xf32> -> vector<8x8xf32>
    %c0_31 = arith.constant 0 : index
    %c24 = arith.constant 24 : index
    %86 = vector.load %arg14[%c0_31, %c24] : memref<8x32xf32, #tpu.memory_space<vmem>>, vector<8x8xf32>
    tpu.vector_store %arg14[%c0_31, %c24], %85 {strides = array<i32>} : memref<8x32xf32, #tpu.memory_space<vmem>>, vector<8x8xf32>,
    %c0_32 = arith.constant 0 : index
    %c0_33 = arith.constant 0 : index
    %87 = vector.load %arg14[%c0_32, %c0_33] : memref<8x32xf32, #tpu.memory_space<vmem>>, vector<8x32xf32>
    %88 = arith.truncf %87 : vector<8x32xf32> to vector<8x32xbf16>
    %c0_34 = arith.constant 0 : index
    %c0_35 = arith.constant 0 : index
    %89 = vector.load %arg6[%c0_34, %c0_35] : memref<32x32xbf16, #tpu.memory_space<vmem>>, vector<32x32xbf16>
    %cst_36 = arith.constant dense<0.000000e+00> : vector<8x32xf32>
    %90 = tpu.matmul %88, %89, %cst_36 {dimension_numbers = #tpu.dot_dimension_numbers<[1], [0], [0], [1], [0, 0, 1, 1], [], []>} : vector<8x32xbf16>, vector<32x32xbf16>, vector<8x32xf32> -> vector<8x32xf32>
    %c3 = arith.constant 3 : index
    %c0_37 = arith.constant 0 : index
    %91 = vector.load %arg10[%c3, %c0_37] : memref<11x32xf32, #tpu.memory_space<vmem>>, vector<1x32xf32>
    %92 = vector.broadcast %91 : vector<1x32xf32> to vector<8x32xf32>
    %93 = arith.addf %90, %92 : vector<8x32xf32>
    %94 = arith.addf %7, %93 : vector<8x32xf32>
    %c5 = arith.constant 5 : index
    %c0_38 = arith.constant 0 : index
    %95 = vector.load %arg10[%c5, %c0_38] : memref<11x32xf32, #tpu.memory_space<vmem>>, vector<1x32xf32>
    %c6 = arith.constant 6 : index
    %c0_39 = arith.constant 0 : index
    %96 = vector.load %arg10[%c6, %c0_39] : memref<11x32xf32, #tpu.memory_space<vmem>>, vector<1x32xf32>
    %cst_40 = arith.constant dense<0.000000e+00> : vector<8xf32>
    %97 = vector.multi_reduction <add>, %94, %cst_40 [1] : vector<8x32xf32> to vector<8xf32>
    %98 = vector.shape_cast %97 : vector<8xf32> to vector<8x1xf32>
    %cst_41 = arith.constant 3.125000e-02 : f32
    %99 = vector.broadcast %cst_41 : f32 to vector<8x1xf32>
    %100 = arith.mulf %98, %99 : vector<8x1xf32>
    %101 = arith.mulf %94, %94 : vector<8x32xf32>
    %cst_42 = arith.constant dense<0.000000e+00> : vector<8xf32>
    %102 = vector.multi_reduction <add>, %101, %cst_42 [1] : vector<8x32xf32> to vector<8xf32>
    %103 = vector.shape_cast %102 : vector<8xf32> to vector<8x1xf32>
    %cst_43 = arith.constant 3.125000e-02 : f32
    %104 = vector.broadcast %cst_43 : f32 to vector<8x1xf32>
    %105 = arith.mulf %103, %104 : vector<8x1xf32>
    %106 = arith.mulf %100, %100 : vector<8x1xf32>
    %107 = arith.subf %105, %106 : vector<8x1xf32>
    %cst_44 = arith.constant 0.000000e+00 : f32
    %108 = vector.broadcast %cst_44 : f32 to vector<8x1xf32>
    %109 = arith.maximumf %107, %108 : vector<8x1xf32>
    %110 = vector.broadcast %100 : vector<8x1xf32> to vector<8x32xf32>
    %111 = arith.subf %94, %110 : vector<8x32xf32>
    %cst_45 = arith.constant 9.99999974E-6 : f32
    %112 = vector.broadcast %cst_45 : f32 to vector<8x1xf32>
    %113 = arith.addf %109, %112 : vector<8x1xf32>
    %114 = math.rsqrt %113 : vector<8x1xf32>
    %115 = vector.broadcast %114 : vector<8x1xf32> to vector<8x32xf32>
    %116 = arith.mulf %111, %115 : vector<8x32xf32>
    %117 = vector.broadcast %95 : vector<1x32xf32> to vector<8x32xf32>
    %118 = arith.mulf %116, %117 : vector<8x32xf32>
    %119 = vector.broadcast %96 : vector<1x32xf32> to vector<8x32xf32>
    %120 = arith.addf %118, %119 : vector<8x32xf32>
    %121 = arith.truncf %120 : vector<8x32xf32> to vector<8x32xbf16>
    %c0_46 = arith.constant 0 : index
    %c0_47 = arith.constant 0 : index
    %122 = vector.load %arg7[%c0_46, %c0_47] : memref<32x64xbf16, #tpu.memory_space<vmem>>, vector<32x64xbf16>
    %cst_48 = arith.constant dense<0.000000e+00> : vector<8x64xf32>
    %123 = tpu.matmul %121, %122, %cst_48 {dimension_numbers = #tpu.dot_dimension_numbers<[1], [0], [0], [1], [0, 0, 1, 1], [], []>} : vector<8x32xbf16>, vector<32x64xbf16>, vector<8x64xf32> -> vector<8x64xf32>
    %c0_49 = arith.constant 0 : index
    %c0_50 = arith.constant 0 : index
    %124 = vector.load %arg9[%c0_49, %c0_50] : memref<1x64xf32, #tpu.memory_space<vmem>>, vector<1x64xf32>
    %125 = vector.broadcast %124 : vector<1x64xf32> to vector<8x64xf32>
    %126 = arith.addf %123, %125 : vector<8x64xf32>
    %cst_51 = arith.constant 0.000000e+00 : f32
    %127 = vector.broadcast %cst_51 : f32 to vector<8x64xf32>
    %128 = arith.maximumf %126, %127 : vector<8x64xf32>
    %129 = arith.truncf %128 : vector<8x64xf32> to vector<8x64xbf16>
    %c0_52 = arith.constant 0 : index
    %c0_53 = arith.constant 0 : index
    %130 = vector.load %arg8[%c0_52, %c0_53] : memref<64x32xbf16, #tpu.memory_space<vmem>>, vector<64x32xbf16>
    %cst_54 = arith.constant dense<0.000000e+00> : vector<8x32xf32>
    %131 = tpu.matmul %129, %130, %cst_54 {dimension_numbers = #tpu.dot_dimension_numbers<[1], [0], [0], [1], [0, 0, 1, 1], [], []>} : vector<8x64xbf16>, vector<64x32xbf16>, vector<8x32xf32> -> vector<8x32xf32>
    %c4 = arith.constant 4 : index
    %c0_55 = arith.constant 0 : index
    %132 = vector.load %arg10[%c4, %c0_55] : memref<11x32xf32, #tpu.memory_space<vmem>>, vector<1x32xf32>
    %133 = vector.broadcast %132 : vector<1x32xf32> to vector<8x32xf32>
    %134 = arith.addf %131, %133 : vector<8x32xf32>
    %135 = arith.addf %120, %134 : vector<8x32xf32>
    %c7 = arith.constant 7 : index
    %c0_56 = arith.constant 0 : index
    %136 = vector.load %arg10[%c7, %c0_56] : memref<11x32xf32, #tpu.memory_space<vmem>>, vector<1x32xf32>
    %c8_57 = arith.constant 8 : index
    %c0_58 = arith.constant 0 : index
    %137 = vector.load %arg10[%c8_57, %c0_58] : memref<11x32xf32, #tpu.memory_space<vmem>>, vector<1x32xf32>
    %cst_59 = arith.constant dense<0.000000e+00> : vector<8xf32>
    %138 = vector.multi_reduction <add>, %135, %cst_59 [1] : vector<8x32xf32> to vector<8xf32>
    %139 = vector.shape_cast %138 : vector<8xf32> to vector<8x1xf32>
    %cst_60 = arith.constant 3.125000e-02 : f32
    %140 = vector.broadcast %cst_60 : f32 to vector<8x1xf32>
    %141 = arith.mulf %139, %140 : vector<8x1xf32>
    %142 = arith.mulf %135, %135 : vector<8x32xf32>
    %cst_61 = arith.constant dense<0.000000e+00> : vector<8xf32>
    %143 = vector.multi_reduction <add>, %142, %cst_61 [1] : vector<8x32xf32> to vector<8xf32>
    %144 = vector.shape_cast %143 : vector<8xf32> to vector<8x1xf32>
    %cst_62 = arith.constant 3.125000e-02 : f32
    %145 = vector.broadcast %cst_62 : f32 to vector<8x1xf32>
    %146 = arith.mulf %144, %145 : vector<8x1xf32>
    %147 = arith.mulf %141, %141 : vector<8x1xf32>
    %148 = arith.subf %146, %147 : vector<8x1xf32>
    %cst_63 = arith.constant 0.000000e+00 : f32
    %149 = vector.broadcast %cst_63 : f32 to vector<8x1xf32>
    %150 = arith.maximumf %148, %149 : vector<8x1xf32>
    %151 = vector.broadcast %141 : vector<8x1xf32> to vector<8x32xf32>
    %152 = arith.subf %135, %151 : vector<8x32xf32>
    %cst_64 = arith.constant 9.99999974E-6 : f32
    %153 = vector.broadcast %cst_64 : f32 to vector<8x1xf32>
    %154 = arith.addf %150, %153 : vector<8x1xf32>
    %155 = math.rsqrt %154 : vector<8x1xf32>
    %156 = vector.broadcast %155 : vector<8x1xf32> to vector<8x32xf32>
    %157 = arith.mulf %152, %156 : vector<8x32xf32>
    %158 = vector.broadcast %136 : vector<1x32xf32> to vector<8x32xf32>
    %159 = arith.mulf %157, %158 : vector<8x32xf32>
    %160 = vector.broadcast %137 : vector<1x32xf32> to vector<8x32xf32>
    %161 = arith.addf %159, %160 : vector<8x32xf32>
    %c9 = arith.constant 9 : index
    %c0_65 = arith.constant 0 : index
    %162 = vector.load %arg10[%c9, %c0_65] : memref<11x32xf32, #tpu.memory_space<vmem>>, vector<1x32xf32>
    %c10 = arith.constant 10 : index
    %c0_66 = arith.constant 0 : index
    %163 = vector.load %arg10[%c10, %c0_66] : memref<11x32xf32, #tpu.memory_space<vmem>>, vector<1x32xf32>
    %cst_67 = arith.constant dense<0.000000e+00> : vector<8xf32>
    %164 = vector.multi_reduction <add>, %161, %cst_67 [1] : vector<8x32xf32> to vector<8xf32>
    %165 = vector.shape_cast %164 : vector<8xf32> to vector<8x1xf32>
    %cst_68 = arith.constant 3.125000e-02 : f32
    %166 = vector.broadcast %cst_68 : f32 to vector<8x1xf32>
    %167 = arith.mulf %165, %166 : vector<8x1xf32>
    %168 = arith.mulf %161, %161 : vector<8x32xf32>
    %cst_69 = arith.constant dense<0.000000e+00> : vector<8xf32>
    %169 = vector.multi_reduction <add>, %168, %cst_69 [1] : vector<8x32xf32> to vector<8xf32>
    %170 = vector.shape_cast %169 : vector<8xf32> to vector<8x1xf32>
    %cst_70 = arith.constant 3.125000e-02 : f32
    %171 = vector.broadcast %cst_70 : f32 to vector<8x1xf32>
    %172 = arith.mulf %170, %171 : vector<8x1xf32>
    %173 = arith.mulf %167, %167 : vector<8x1xf32>
    %174 = arith.subf %172, %173 : vector<8x1xf32>
    %cst_71 = arith.constant 0.000000e+00 : f32
    %175 = vector.broadcast %cst_71 : f32 to vector<8x1xf32>
    %176 = arith.maximumf %174, %175 : vector<8x1xf32>
    %177 = vector.broadcast %167 : vector<8x1xf32> to vector<8x32xf32>
    %178 = arith.subf %161, %177 : vector<8x32xf32>
    %cst_72 = arith.constant 9.99999997E-7 : f32
    %179 = vector.broadcast %cst_72 : f32 to vector<8x1xf32>
    %180 = arith.addf %176, %179 : vector<8x1xf32>
    %181 = math.rsqrt %180 : vector<8x1xf32>
    %182 = vector.broadcast %181 : vector<8x1xf32> to vector<8x32xf32>
    %183 = arith.mulf %178, %182 : vector<8x32xf32>
    %184 = vector.broadcast %162 : vector<1x32xf32> to vector<8x32xf32>
    %185 = arith.mulf %183, %184 : vector<8x32xf32>
    %186 = vector.broadcast %163 : vector<1x32xf32> to vector<8x32xf32>
    %187 = arith.addf %185, %186 : vector<8x32xf32>
    %188 = arith.addf %7, %187 : vector<8x32xf32>
    %c0_73 = arith.constant 0 : index
    %c0_74 = arith.constant 0 : index
    %c0_75 = arith.constant 0 : index
    %189 = vector.load %arg11[%c0_73, %c0_74, %c0_75] : memref<1x8x32xf32, #tpu.memory_space<vmem>>, vector<1x8x32xf32>
    %190 = vector.shape_cast %189 : vector<1x8x32xf32> to vector<8x32xf32>
    %191 = vector.shape_cast %188 : vector<8x32xf32> to vector<1x8x32xf32>
    tpu.vector_store %arg11[%c0_73, %c0_74, %c0_75], %191 {strides = array<i32>} : memref<1x8x32xf32, #tpu.memory_space<vmem>>, vector<1x8x32xf32>,
    return
  }
  func.func @transform_0(%arg0: i32, %arg1: i32) -> (i32, i32, i32) {
    %c0_i32 = arith.constant 0 : i32
    %c0_i32_0 = arith.constant 0 : i32
    %c0_i32_1 = arith.constant 0 : i32
    return %arg0, %c0_i32, %c0_i32_0 : i32, i32, i32
  }
  func.func @transform_1(%arg0: i32, %arg1: i32) -> (i32, i32) {
    %c0_i32 = arith.constant 0 : i32
    %c0_i32_0 = arith.constant 0 : i32
    %c0_i32_1 = arith.constant 0 : i32
    return %c0_i32, %c0_i32_0 : i32, i32
  }
  func.func @transform_2(%arg0: i32, %arg1: i32) -> (i32, i32) {
    %c0_i32 = arith.constant 0 : i32
    %c0_i32_0 = arith.constant 0 : i32
    %c0_i32_1 = arith.constant 0 : i32
    return %c0_i32, %c0_i32_0 : i32, i32
  }
  func.func @transform_3(%arg0: i32, %arg1: i32) -> (i32, i32) {
    %c0_i32 = arith.constant 0 : i32
    %c0_i32_0 = arith.constant 0 : i32
    %c0_i32_1 = arith.constant 0 : i32
    return %c0_i32, %c0_i32_0 : i32, i32
  }
  func.func @transform_4(%arg0: i32, %arg1: i32) -> (i32, i32) {
    %c0_i32 = arith.constant 0 : i32
    %c0_i32_0 = arith.constant 0 : i32
    %c0_i32_1 = arith.constant 0 : i32
    return %c0_i32, %c0_i32_0 : i32, i32
  }
  func.func @transform_5(%arg0: i32, %arg1: i32) -> (i32, i32) {
    %c0_i32 = arith.constant 0 : i32
    %c0_i32_0 = arith.constant 0 : i32
    %c0_i32_1 = arith.constant 0 : i32
    return %c0_i32, %c0_i32_0 : i32, i32
  }
  func.func @transform_6(%arg0: i32, %arg1: i32) -> (i32, i32) {
    %c0_i32 = arith.constant 0 : i32
    %c0_i32_0 = arith.constant 0 : i32
    %c0_i32_1 = arith.constant 0 : i32
    return %c0_i32, %c0_i32_0 : i32, i32
  }
  func.func @transform_7(%arg0: i32, %arg1: i32) -> (i32, i32) {
    %c0_i32 = arith.constant 0 : i32
    %c0_i32_0 = arith.constant 0 : i32
    %c0_i32_1 = arith.constant 0 : i32
    return %c0_i32, %c0_i32_0 : i32, i32
  }
  func.func @transform_8(%arg0: i32, %arg1: i32) -> (i32, i32) {
    %c0_i32 = arith.constant 0 : i32
    %c0_i32_0 = arith.constant 0 : i32
    %c0_i32_1 = arith.constant 0 : i32
    return %c0_i32, %c0_i32_0 : i32, i32
  }
  func.func @transform_9(%arg0: i32, %arg1: i32) -> (i32, i32, i32) {
    %c0_i32 = arith.constant 0 : i32
    %c0_i32_0 = arith.constant 0 : i32
    return %arg0, %arg1, %c0_i32 : i32, i32, i32
  }
}

</mosaic_0001>

<bundles_post_ra>
// kernel: tpu_custom_call.1
= control target key start
LH: loop header
LB: loop body
LE: loop exit
PB: predicated region body
PF: predicated region fallthrough
CT: control target
= control target key end

     0   :  { %s2478_s0 = inlined_call_operand.vmem [shape: f32[2,8,32], index: 0, kind: input, shape index: {}]   ;;  %s2479_s1 = inlined_call_operand.vmem [shape: bf16[32,32], index: 1, kind: input, shape index: {}]   ;;  %s2480_s2 = inlined_call_operand.vmem [shape: bf16[32,32], index: 2, kind: input, shape index: {}]   ;;  %s2481_s3 = inlined_call_operand.hbm [shape: bf16[32,32], index: 3, kind: input, shape index: {}]   ;;  %s2482_s4 = inlined_call_operand.hbm [shape: bf16[32,32], index: 4, kind: input, shape index: {}]   ;;  %s2483_s5 = inlined_call_operand.hbm [shape: bf16[32,64], index: 5, kind: input, shape index: {}]   ;;  %s2484_s6 = inlined_call_operand.vmem [shape: bf16[64,32], index: 6, kind: input, shape index: {}]   ;;  %s2485_s7 = inlined_call_operand.vmem [shape: f32[1,64], index: 7, kind: input, shape index: {}]   ;;  %s2486_s8 = inlined_call_operand.hbm [shape: f32[11,32], index: 8, kind: input, shape index: {}]   ;;  %s2487_s9 = inlined_call_operand.hbm [shape: f32[2,8,32], index: 9, kind: output, shape index: {}]  }
   0x1   :  { %2499 = sst [smem:[#allocation25_spill]] %s2482_s4 }
   0x2   :  { %14 = vsyncpa [#allocation6], 0 }
   0x3   :  { %15 = vsyncpa [#allocation9], 0 }
   0x4   :  { %16 = vsyncpa [#allocation12], 0 }
   0x5   :  { %17 = vsyncpa [#allocation7], 0 }
   0x6   :  { %19 = vsyncpa [#allocation7 + $0x1], 0  ;;  %s2118_s30 = smov 0   ;;  %s2120_s10 = smov 0  }
   0x7   :  { %s2122_s11 = smov 0   ;;  %s2124_s12 = smov 0  }
   0x8   :  { %s2126_s13 = smov 0   ;;  %s2128_s14 = smov 0  }
   0x9 LB: > { %2500 = sst [smem:[#allocation18_spill]] %s2029_s30  ;;  %s1504_s15 = sadd.s32 4294967295, %s2049_s14   ;;  %s2049_s14 = sphi %s2128_s14, %s25_s14   ;;  %s2045_s13 = sphi %s2126_s13, %s2524_s13   ;;  %s2041_s12 = sphi %s2124_s12, %s2523_s12   ;;  %s2037_s11 = sphi %s2122_s11, %s2522_s11   ;;  %s2033_s10 = sphi %s2120_s10, %s2526_s10   ;;  %s2029_s30 = sphi %s2118_s30, %s2525_s30  }
   0xa   : > { %2501 = sst [smem:[#allocation19_spill]] %s2037_s11  ;;  %s1505_s16 = sadd.s32 4294967294, %s2049_s14  }
   0xb   : > { %2502 = sst [smem:[#allocation20_spill]] %s2045_s13  ;;  %s37_s17 = sadd.s32 1, %s2045_s13 }
   0xc   : > { %2503 = sst [smem:[#allocation21_spill]] %s2049_s14  ;;  %s240_s18 = sadd.s32 1, %s2037_s11 }
   0xd   : > { %p39_p0 = scmp.ge.s32.totalorder %s37_s17, 2  ;;  %p250_p1 = scmp.ne.s32.totalorder %s2037_s11, %s2033_s10 }
   0xe   : > { %p251_p2 = scmp.eq.s32.totalorder %s1504_s15, 1  ;;  %p256_p3 = scmp.ne.s32.totalorder %s2033_s10, %s2029_s30 }
   0xf   : > { %s2528_s17 = smov (%p39_p0, %s37_s17), 0  ;;  %p257_p5 = scmp.eq.s32.totalorder %s1505_s16, 1 }
  0x10   : > { %2504 = sst [smem:[#allocation22_spill]] %s2528_s17  ;;  %p2158_p4 = por %p251_p2, %p250_p1 }
  0x11   : > { %s235_s20 = ssub.s32 %s2045_s13, %s2528_s17  ;;  %p1506_p6 = scmp.ge.s32.totalorder %s2049_s14, 1 }
  0x12   : > { %s2505_s19 = scalar_select %p2158_p4, 1, 0 }
  0x13   : > { %p238_p7 = scmp.eq.s32.totalorder %s235_s20, 0  ;;  %p2165_p8 = por %p257_p5, %p256_p3 }
  0x14   : > { %p264_p9 = scmp.lt.s32.totalorder %s2049_s14, 3  ;;  %p2177_p11 = scmp.eq.s32.totalorder %s1504_s15, 0 }
  0x15   : > { %s2506_s21 = scalar_select %p2165_p8, 1, 0 }
  0x16   : > { %s2171_s22 = scalar_select %p238_p7, %s2037_s11, %s240_s18  }
  0x17   : > { %2507 = sst [smem:[#allocation23_spill]] %s2506_s21  ;;  %p2173_p10 = pnand %p1506_p6, %p264_p9 }
  0x18   : > { %2508 = sst [smem:[#allocation24_spill]] %s2171_s22  ;;  %s2051_s25 = smov [#allocation8]  }
  0x19   : > { %s2509_s23 = scalar_select %p2173_p10, 1, 0 }
  0x1a   : > { %s2510_s24 = scalar_select %p2177_p11, 1, 0 }
  0x1b   : > { %p1719_p12 = pneg %p2173_p10  ;;  %s295_s26 = sshll.u32 %s2051_s25, 4  ;;  %s296_s26 = int_to_ptr.vmem [resolvable:$true] %s295_s26 }
  0x1c   : > { %s2052_s28 = smov [#allocation5]   ;;  %s2512_s4 = sld [smem:[#allocation25_spill]] }
  0x1d   : > { %p2185_p13 = pnand %p2177_p11, %p1719_p12  ;;  %s282_s29 = sshll.u32 %s2052_s28, 4  ;;  %s283_s29 = int_to_ptr.vmem [resolvable:$true] %s282_s29 }
  0x1f   : > { %p2197_p1 = pneg %p2185_p13 }
  0x22   : > { %s1847_s15 = scalar_lea.hbm %s2512_s4, 256 }
  0x23   : > { %p1848_p0 = scmp.ne.s32.totalorder %s2512_s4, %s1847_s15  ;;  %p1854_p5 = scmp.lt.u32.totalorder %s1847_s15, %s2512_s4 }
  0x25   : > { %p1850_p2 = pnand %p2197_p1, %p1848_p0 }
  0x27   : > { %p1851_p3 = pneg %p1850_p2 }
  0x29   : > { %p1856_p6 = pnand %p1854_p5, %p1851_p3 }
  0x2b   : > { %1859 = shalt.err (!%p1856_p6)
}
  0x2c   : > { %s1860_s28 = scalar_lea.vmem %s296_s26, 256  ;;  %p1868_p8 = scmp.lt.s32.totalorder %s296_s26, %s296_s26 }
  0x2d   : > { %p1861_p7 = scmp.ne.s32.totalorder %s296_s26, %s1860_s28  ;;  %p1869_p4 = scmp.lt.s32.totalorder %s1860_s28, %s1860_s28 }
  0x2f   : > { %p1863_p9 = pnand %p1861_p7, %p2197_p1  ;;  %p1870_p11 = por %p1869_p4, %p1868_p8 }
  0x31   : > { %p1864_p12 = pneg %p1863_p9 }
  0x33   : > { %p1871_p10 = pnand %p1870_p11, %p1864_p12 }
  0x35   : > { %1874 = shalt.err (!%p1871_p10)
}
  0x36   : > { %s2053_s17 = smov 64   ;;  %s2054_s16 = smov 4  }
  0x37   : > { %1725 = dma.hbm_to_vmem [thread:$0]  (!%p2185_p13), %s2512_s4, 256, %s296_s26, [#allocation9], %s2053_s17, %s2053_s17, %s2054_s16  }
  0x38   : > { %s1875_s20 = scalar_lea.hbm %s2481_s3, 256 }
  0x39   : > { %p1876_p4 = scmp.ne.s32.totalorder %s2481_s3, %s1875_s20  ;;  %p1882_p11 = scmp.lt.u32.totalorder %s1875_s20, %s2481_s3 }
  0x3b   : > { %p1878_p8 = pnand %p1876_p4, %p2197_p1 }
  0x3d   : > { %p1879_p10 = pneg %p1878_p8 }
  0x3f   : > { %p1884_p0 = pnand %p1882_p11, %p1879_p10 }
  0x41   : > { %1887 = shalt.err (!%p1884_p0)
}
  0x42   : > { %s1888_s13 = scalar_lea.vmem %s283_s29, 256  ;;  %p1896_p6 = scmp.lt.s32.totalorder %s283_s29, %s283_s29 }
  0x43   : > { %p1889_p2 = scmp.ne.s32.totalorder %s283_s29, %s1888_s13  ;;  %p1897_p7 = scmp.lt.s32.totalorder %s1888_s13, %s1888_s13 }
  0x45   : > { %p1891_p3 = pnand %p1889_p2, %p2197_p1  ;;  %p1898_p9 = por %p1897_p7, %p1896_p6 }
  0x47   : > { %p1892_p5 = pneg %p1891_p3 }
  0x49   : > { %p1899_p12 = pnand %p1898_p9, %p1892_p5 }
  0x4b   : > { %1902 = shalt.err (!%p1899_p12)
}
  0x4c   : > { %1722 = dma.hbm_to_vmem [thread:$0]  (!%p2185_p13), %s2481_s3, 256, %s283_s29, [#allocation6], %s2053_s17, %s2053_s17, %s2054_s16  }
  0x4d   : > { %s2055_s21 = smov [#allocation10]   ;;  %s2056_s22 = smov [#allocation11]  }
  0x4e   : > { %s308_s26 = sshll.u32 %s2055_s21, 4  ;;  %s327_s18 = sshll.u32 %s2056_s22, 4  ;;  %s309_s26 = int_to_ptr.vmem [resolvable:$true] %s308_s26  ;;  %s328_s18 = int_to_ptr.vmem [resolvable:$true] %s327_s18 }
  0x4f   : > { %s1903_s28 = scalar_lea.hbm %s2483_s5, 256 }
  0x50   : > { %p1904_p4 = scmp.ne.s32.totalorder %s2483_s5, %s1903_s28  ;;  %p1910_p11 = scmp.lt.u32.totalorder %s1903_s28, %s2483_s5 }
  0x52   : > { %p1906_p8 = pnand %p1904_p4, %p2197_p1 }
  0x54   : > { %p1907_p10 = pneg %p1906_p8 }
  0x56   : > { %p1912_p0 = pnand %p1910_p11, %p1907_p10 }
  0x58   : > { %1915 = shalt.err (!%p1912_p0)
}
  0x59   : > { %s1916_s29 = scalar_lea.vmem %s309_s26, 256  ;;  %p1924_p6 = scmp.lt.s32.totalorder %s309_s26, %s309_s26 }
  0x5a   : > { %p1917_p2 = scmp.ne.s32.totalorder %s309_s26, %s1916_s29  ;;  %p1925_p7 = scmp.lt.s32.totalorder %s1916_s29, %s1916_s29 }
  0x5c   : > { %p1919_p3 = pnand %p1917_p2, %p2197_p1  ;;  %p1926_p9 = por %p1925_p7, %p1924_p6 }
  0x5e   : > { %p1920_p5 = pneg %p1919_p3 }
  0x60   : > { %p1927_p12 = pnand %p1926_p9, %p1920_p5 }
  0x62   : > { %1930 = shalt.err (!%p1927_p12)
}
  0x63   : > { %1728 = dma.hbm_to_vmem [thread:$0]  (!%p2185_p13), %s2483_s5, 256, %s309_s26, [#allocation9], %s2053_s17, %s2053_s17, %s2054_s16  }
  0x64   : > { %s1931_s22 = scalar_lea.hbm %s2486_s8, 256 }
  0x65   : > { %p1932_p4 = scmp.ne.s32.totalorder %s2486_s8, %s1931_s22  ;;  %p1938_p11 = scmp.lt.u32.totalorder %s1931_s22, %s2486_s8 }
  0x67   : > { %p1934_p8 = pnand %p1932_p4, %p2197_p1 }
  0x69   : > { %p1935_p10 = pneg %p1934_p8 }
  0x6b   : > { %p1940_p0 = pnand %p1938_p11, %p1935_p10 }
  0x6d   : > { %1943 = shalt.err (!%p1940_p0)
}
  0x6e   : > { %s1944_s30 = scalar_lea.vmem %s328_s18, 256  ;;  %p1952_p6 = scmp.lt.s32.totalorder %s328_s18, %s328_s18 }
  0x6f   : > { %p1945_p2 = scmp.ne.s32.totalorder %s328_s18, %s1944_s30  ;;  %p1953_p7 = scmp.lt.s32.totalorder %s1944_s30, %s1944_s30 }
  0x71   : > { %p1947_p3 = pnand %p1945_p2, %p2197_p1  ;;  %p1954_p9 = por %p1953_p7, %p1952_p6 }
  0x73   : > { %p1948_p5 = pneg %p1947_p3 }
  0x75   : > { %p1955_p12 = pnand %p1954_p9, %p1948_p5 }
  0x77   : > { %1958 = shalt.err (!%p1955_p12)
}
  0x78   : > { %s2057_s17 = smov 128   ;;  %s2058_s16 = smov 8  }
  0x79   : > { %1731 = dma.hbm_to_vmem [thread:$0]  (!%p2185_p13), %s2486_s8, 256, %s328_s18, [#allocation12], %s2057_s17, %s2057_s17, %s2058_s16  }
  0x7a   : > { %p2514_p4 = scmp.ne.s32.totalorder %s2509_s23, 0 }
  0x7b   : > { %p2515_p8 = scmp.ne.s32.totalorder (!%p2514_p4), %s2510_s24, 0 }
  0x7c   : > { %350 = sbr.rel (%p2514_p4) target bundleno = 2557 (0x9fd), region = 56 }
  0x83   : > { %2012 = dma.done.wait (%p2515_p8), [#allocation6], 256  }
  0x84   : > { %2014 = vsyncadd (%p2515_p8), [#allocation6], 4294967040 }
  0x85   : > { %2016 = dma.done.wait (%p2515_p8), [#allocation9], 512  }
  0x86   : > { %2018 = vsyncadd (%p2515_p8), [#allocation9], 4294966784 }
  0x87   : > { %2020 = dma.done.wait (%p2515_p8), [#allocation12], 256  }
  0x88   : > { %2022 = vsyncadd (%p2515_p8), [#allocation12], 4294967040  ;;  %p397_p13 = scmp.lt.s32.totalorder %s2041_s12, 1  ;;  %v2059_v0 = vmov 0.0   ;;  %vm2060_vm0 = vmmov 0   ;;  %v1809_v1 = vld [vmem:[%s2480_s2] sm:$0xff]  }
  0x89   : > { %1601 = vmatprep.subr.bf16.mxu0 %v2059_v0  ;;  %1605 = vmatprep.mubr.msk.bf16.mxu0 %vm2060_vm0, %v2059_v0  ;;  %v1810_v2 = vld [vmem:[%s2480_s2 + $0x8] sm:$0xff]   ;;  %vm429_vm1 = vcmask 261120   ;;  %v1811_v4 = vld [vmem:[%s2479_s1] sm:$0xff]   ;;  %v1813_v7 = vld [vmem:[#allocation5] sm:$0xff]   ;;  %vm535_vm2 = vcmask 257024   ;;  %vm612_vm3 = vcmask 64512  }
  0x8a   : > { %s398_s23 = scalar_select %p397_p13, %s2041_s12, 1  ;;  %1609 = vmatprep.subr.bf16.mxu1 %v2059_v0  ;;  %1613 = vmatprep.mubr.msk.bf16.mxu1 %vm2060_vm0, %v2059_v0  ;;  %v1812_v6 = vld [vmem:[%s2479_s1 + $0x8] sm:$0xff]   ;;  %v1814_v8 = vld [vmem:[#allocation5 + $0x8] sm:$0xff]   ;;  %v1519_v9 = vld [vmem:[#allocation11 + $0x1] ss:$0 sm:$0xff]  ;;  %vm674_vm4 = vcmask 1043456  }
  0x8b   : > { %1602 = vmatpush3.bf16.msra.mxu0 %v1809_v1  ;;  %1610 = vmatpush3.bf16.msra.mxu1 %v1813_v7  ;;  %v1527_v16 = vld [vmem:[#allocation11] ss:$0 sm:$0xff]  ;;  %s2061_s13 = smov 112   ;;  %s2062_s30 = smov 120   ;;  %v1523_v27 = vld [vmem:[#allocation11 + $0x2] ss:$0 sm:$0xff] }
  0x8c   : > { %s1518_s27 = sshll.u32 %s398_s23, 3  ;;  %1603 = vmatprep.subr.bf16.mxu0 %v2059_v0  ;;  %1611 = vmatprep.subr.bf16.mxu1 %v2059_v0  ;;  %s2063_s17 = smov 104   ;;  %vm840_vm5 = vcmask 130112   ;;  %vm956_vm6 = vcmask 195712   ;;  %vm1072_vm7 = vcmask 261312   ;;  %vm1275_vm8 = vcmask 523264  }
  0x8d   : > { %s400_s18 = scalar_lea.vmem %s2478_s0, %s1518_s27  ;;  %s2064_s16 = smov 8  }
  0x8e   : > { %v2307_v3 = vld [vmem:[%s400_s18] sm:$0xff]  ;;  %s2065_s26 = smov 16   ;;  %s2066_s29 = smov 24  }
  0x8f   : > { %v407_v5 = vpack.c.bf16 %v2307_v3, %v2307_v3  ;;  %1604 = vmatpush3.bf16.msra.mxu0 %v1810_v2  ;;  %1612 = vmatpush3.bf16.msra.mxu1 %v1814_v8  ;;  %s394_s15 = sand.u32 1, %s2033_s10   ;;  %s1562_s28 = sshll.u32 %s2041_s12, 7 }
  0x90   : > { %1617 = vmatprep.subr.bf16.mxu0 %v2059_v0  ;;  %1625 = vmatprep.subr.bf16.mxu1 %v2059_v0  ;;  %s1517_s20 = sshll.u32 %s394_s15, 3  ;;  %p2516_p10 = scmp.ne.s32.totalorder %s2505_s19, 0 }
  0x91   : > { %s2067_s12 = smov [#allocation13]  }
  0x92   : > { %1606 = vmatmul.mubr.msk.bf16.vlgmr.msra.gmra.mrb[0].mxu0 %vm429_vm1, %v407_v5  ;;  %1614 = vmatmul.mubr.msk.bf16.vlgmr.msra.gmra.mrb[0].mxu1 %vm429_vm1, %v407_v5  ;;  %s1963_s27 = sshll.u32 %s2067_s12, 4  ;;  %s1964_s27 = int_to_ptr.vmem [resolvable:$false] %s1963_s27 }
  0x93   : > { %1618 = vmatpush3.bf16.msra.mxu0 %v1811_v4  ;;  %1621 = vmatprep.mubr.msk.bf16.mxu0 %vm2060_vm0, %v2059_v0  ;;  %s1965_s25 = scalar_lea.vmem %s1964_s27, 256 }
  0x94   : > { %1619 = vmatprep.subr.bf16.mxu0 %v2059_v0  ;;  %1627 = vmatprep.mubr.msk.bf16.mxu1 %vm2060_vm0, %v2059_v0 }
  0x97   : > { %1620 = vmatpush3.bf16.msra.mxu0 %v1812_v6 }
  0x98   : > { %1631 = vmatprep.subr.bf16.mxu0 %v2059_v0 }
  0x9a   : > { %1622 = vmatmul.mubr.msk.bf16.vlgmr.msra.gmra.mrb[4].mxu0 %vm429_vm1, %v407_v5 }
  0x9b   : > { %1633 = vmatprep.mubr.msk.bf16.mxu0 %vm2060_vm0, %v2059_v0 }
 0x165   : > { %v467_v10 = vpop.f32.mrb[0].mxu0  ;;  %v528_v28 = vpop.f32.mrb[0].mxu1 }
 0x166   : > { %v468_v11 = vadd.f32 %v1519_v9, %v467_v10  ;;  %v1607_v12 = vpop.f32.mrb[1].mxu0  ;;  %v529_v29 = vadd.f32 %v1523_v27, %v528_v28  ;;  %v1615_v30 = vpop.f32.mrb[1].mxu1 }
 0x167   : > { %v470_v13 = vpop.f32.mrb[2].mxu0  ;;  %v531_v31 = vpop.f32.mrb[2].mxu1 }
 0x168   : > { %v534_v14 = vpack.c.bf16 %v468_v11, %v468_v11  ;;  %v1608_v15 = vpop.f32.mrb[3].mxu0  ;;  %v537_v32 = vpack.c.bf16 %v529_v29, %v529_v29  ;;  %v1616_v33 = vpop.f32.mrb[3].mxu1 }
 0x16a   : > { %536 = vst.msk [vmem:[#allocation2] sm:$0xf] %vm535_vm2, %v534_v14  ;;  %538 = vst.msk [vmem:[#allocation3] sm:$0xf] %vm535_vm2, %v537_v32 }
 0x16d   : > { %v602_v17 = vpop.f32.mrb[4].mxu0 }
 0x16e   : > { %v603_v18 = vadd.f32 %v1527_v16, %v602_v17  ;;  %v1623_v19 = vpop.f32.mrb[5].mxu0 }
 0x16f   : > { %v605_v20 = vpop.f32.mrb[6].mxu0 }
 0x170   : > { %v608_v21 = vmul.f32 0.35355338, %v603_v18  ;;  %v1624_v22 = vpop.f32.mrb[7].mxu0 }
 0x171   : > { %v609_v23 = vld [vmem:[#allocation2] sm:$0xf]  ;;  %v610_v34 = vld [vmem:[#allocation3] sm:$0xf] }
 0x172   : > { %v617_v24 = vsel %vm612_vm3, %v609_v23, 0  ;;  %v1533_v25 = vcombine.low %v609_v23, %v609_v23  ;;  %v611_v26 = vpack.c.bf16 %v608_v21, %v608_v21  ;;  %v676_v35 = vsel %vm674_vm4, %v610_v34, 0 }
 0x173   : > { %1626 = vmatpush3.bf16.xpose.msra.mxu1 %v617_v24  ;;  %1632 = vmatpush3.bf16.msra.mxu0 %v676_v35  ;;  %v1535_v8 = vcombine.low %v610_v34, %v610_v34 }
 0x174   : > { %844 = vrot.lane.b32.xlu1 %v1533_v25, %s2061_s13  ;;  %725 = vrot.lane.b32.xlu0 %v1533_v25, %s2062_s30 }
 0x175   : > { %1637 = vmatprep.subr.bf16.mxu1 %v2059_v0  ;;  %1643 = vmatprep.subr.bf16.mxu0 %v2059_v0 }
 0x178   : > { %842 = vrot.lane.b32.xlu1 %v611_v26, %s2061_s13  ;;  %720 = vrot.lane.b32.xlu0 %v611_v26, %s2062_s30 }
 0x17a   : > { %1628 = vmatmul.mubr.msk.bf16.vlgmr.msra.gmra.mrb[4].mxu1 %vm612_vm3, %v611_v26 }
 0x17b   : > { %1639 = vmatprep.mubr.msk.bf16.mxu1 %vm2060_vm0, %v2059_v0 }
 0x17c   : > { %958 = vrot.lane.b32.xlu1 %v611_v26, %s2063_s17  ;;  %960 = vrot.lane.b32.xlu0 %v1533_v25, %s2063_s17 }
 0x1e6   : > { %v726_v36 = vpop.permute.xlu0 %725  ;;  %v845_v38 = vpop.permute.xlu1 %844 }
 0x1e7   : > { %v731_v37 = vsel %vm612_vm3, %v726_v36, 0  ;;  %v850_v40 = vsel %vm612_vm3, %v845_v38, 0 }
 0x1e8   : > { %1638 = vmatpush3.bf16.xpose.msra.mxu1 %v731_v37 }
 0x1e9   : > { %1649 = vmatprep.subr.bf16.mxu1 %v2059_v0 }
 0x1ea   : > { %v721_v39 = vpop.permute.xlu0 %720  ;;  %v843_v42 = vpop.permute.xlu1 %842 }
 0x1ee   : > { %v961_v41 = vpop.permute.xlu0 %960  ;;  %v959_v44 = vpop.permute.xlu1 %958 }
 0x1ef   : > { %1640 = vmatmul.mubr.msk.bf16.vlgmr.msra.gmra.mrb[8].mxu1 %vm612_vm3, %v721_v39  ;;  %v966_v43 = vsel %vm612_vm3, %v961_v41, 0 }
 0x1f0   : > { %1650 = vmatpush3.bf16.xpose.msra.mxu1 %v850_v40  ;;  %1651 = vmatprep.mubr.msk.bf16.mxu1 %vm2060_vm0, %v2059_v0 }
 0x1f1   : > { %1661 = vmatprep.subr.bf16.mxu1 %v2059_v0 }
 0x1f7   : > { %1652 = vmatmul.mubr.msk.bf16.vlgmr.msra.gmra.mrb[12].mxu1 %vm612_vm3, %v843_v42 }
 0x1f8   : > { %1662 = vmatpush3.bf16.xpose.msra.mxu1 %v966_v43  ;;  %1663 = vmatprep.mubr.msk.bf16.mxu1 %vm2060_vm0, %v2059_v0 }
 0x1f9   : > { %1673 = vmatprep.subr.bf16.mxu1 %v2059_v0 }
 0x1ff   : > { %1664 = vmatmul.mubr.msk.bf16.vlgmr.msra.gmra.mrb[16].mxu1 %vm612_vm3, %v959_v44 }
 0x200   : > { %1677 = vmatprep.mubr.msk.bf16.mxu1 %vm2060_vm0, %v2059_v0 }
 0x24d   : > { %v653_v45 = vpop.f32.mrb[4].mxu1 }
 0x24e   : > { %v1629_v46 = vpop.f32.mrb[5].mxu1  ;;  %v659_v47 = vsel %vm612_vm3, %v653_v45, -inf }
 0x24f   : > { %660 = vmax.xlane.f32.xlu0 %v659_v47  ;;  %v656_v48 = vpop.f32.mrb[6].mxu1 }
 0x250   : > { %v1630_v49 = vpop.f32.mrb[7].mxu1 }
 0x2c2   : > { %v767_v50 = vpop.f32.mrb[8].mxu1 }
 0x2c3   : > { %v1641_v51 = vpop.f32.mrb[9].mxu1  ;;  %v773_v52 = vsel %vm612_vm3, %v767_v50, -inf }
 0x2c4   : > { %774 = vmax.xlane.f32.xlu1 %v773_v52  ;;  %v770_v53 = vpop.f32.mrb[10].mxu1 }
 0x2c5   : > { %v1642_v54 = vpop.f32.mrb[11].mxu1 }
 0x2c6   : > { %v1817_v54 = vld [vmem:[#allocation8] sm:$0xff]  }
 0x2c7   : > { %1674 = vmatpush3.bf16.msra.mxu1 %v1817_v54 }
 0x2c8   : > { %1675 = vmatprep.subr.bf16.mxu1 %v2059_v0 }
 0x2ca   : > { %v886_v55 = vpop.f32.mrb[12].mxu1 }
 0x2cb   : > { %v1653_v56 = vpop.f32.mrb[13].mxu1  ;;  %v892_v57 = vsel %vm612_vm3, %v886_v55, -inf }
 0x2cc   : > { %893 = vmax.xlane.f32.xlu0 %v892_v57  ;;  %v889_v58 = vpop.f32.mrb[14].mxu1 }
 0x2cd   : > { %v1654_v59 = vpop.f32.mrb[15].mxu1 }
 0x2d2   : > { %v1002_v60 = vpop.f32.mrb[16].mxu1 }
 0x2d3   : > { %v1665_v61 = vpop.f32.mrb[17].mxu1  ;;  %v1008_v62 = vsel %vm612_vm3, %v1002_v60, -inf }
 0x2d4   : > { %1009 = vmax.xlane.f32.xlu0 %v1008_v62  ;;  %v1005_v63 = vpop.f32.mrb[18].mxu1 }
 0x2d5   : > { %v1666_v1 = vpop.f32.mrb[19].mxu1 }
 0x2dc   : > { %v661_v2 = vpop.xlane.xlu0 %660 }
 0x2dd   : > { %v662_v4 = vsub.f32 %v653_v45, %v661_v2 }
 0x2df   : > { %v663_v5 = vmul.f32 1.442695, %v662_v4 }
 0x2e1   : > { %1825 = vpow2.f32 %v663_v5 }
 0x2eb   : > { %v1826_v6 = vpop.eup %1825 }
 0x2ec   : > { %v665_v7 = vsel %vm612_vm3, %v1826_v6, 0.0 }
 0x2ed   : > { %666 = vadd.xlane.f32.xlu1 %v665_v7  ;;  %v1541_v7 = vld [vmem:[#allocation11 + $0x3] ss:$0 sm:$0xff] }
 0x2fe   : > { %788 = vrot.lane.b32.xlu1 %v1535_v8, %s2062_s30 }
 0x351   : > { %v775_v9 = vpop.xlane.xlu1 %774 }
 0x352   : > { %v776_v10 = vsub.f32 %v767_v50, %v775_v9 }
 0x354   : > { %v777_v11 = vmul.f32 1.442695, %v776_v10 }
 0x356   : > { %1827 = vpow2.f32 %v777_v11 }
 0x359   : > { %v894_v12 = vpop.xlane.xlu0 %893 }
 0x35a   : > { %v895_v13 = vsub.f32 %v886_v55, %v894_v12  ;;  %v1818_v55 = vld [vmem:[#allocation8 + $0x8] sm:$0xff]  }
 0x35b   : > { %1676 = vmatpush3.bf16.msra.mxu1 %v1818_v55 }
 0x35c   : > { %v896_v14 = vmul.f32 1.442695, %v895_v13  ;;  %1689 = vmatprep.subr.bf16.mxu1 %v2059_v0 }
 0x35e   : > { %1829 = vpow2.f32 %v896_v14 }
 0x360   : > { %v1828_v15 = vpop.eup %1827 }
 0x361   : > { %v1010_v16 = vpop.xlane.xlu0 %1009  ;;  %v779_v17 = vsel %vm612_vm3, %v1828_v15, 0.0 }
 0x362   : > { %v1011_v18 = vsub.f32 %v1002_v60, %v1010_v16  ;;  %780 = vadd.xlane.f32.xlu0 %v779_v17  ;;  %v1819_v17 = vld [vmem:[#allocation10] sm:$0xff]  }
 0x364   : > { %v1012_v19 = vmul.f32 1.442695, %v1011_v18  ;;  %v1820_v18 = vld [vmem:[#allocation10 + $0x8] sm:$0xff]  }
 0x366   : > { %1831 = vpow2.f32 %v1012_v19  ;;  %v1821_v19 = vld [vmem:[%s2484_s6] sm:$0xff]  }
 0x368   : > { %v1830_v20 = vpop.eup %1829 }
 0x369   : > { %v898_v21 = vsel %vm612_vm3, %v1830_v20, 0.0 }
 0x36a   : > { %899 = vadd.xlane.f32.xlu1 %v898_v21 }
 0x370   : > { %v1832_v22 = vpop.eup %1831 }
 0x371   : > { %v1014_v23 = vsel %vm612_vm3, %v1832_v22, 0.0 }
 0x372   : > { %1015 = vadd.xlane.f32.xlu0 %v1014_v23 }
 0x37a   : > { %v667_v24 = vpop.xlane.xlu1 %666 }
 0x37b   : > { %1833 = vrcp.f32 %v667_v24  ;;  %1020 = vrot.lane.b32.xlu1 %v1535_v8, %s2063_s17 }
 0x37e   : > { %v789_v27 = vpop.permute.xlu1 %788 }
 0x37f   : > { %v794_v29 = vsel %vm674_vm4, %v789_v27, 0 }
 0x385   : > { %v1834_v25 = vpop.eup %1833 }
 0x386   : > { %v669_v26 = vmul.f32 %v1834_v25, %v1826_v6 }
 0x388   : > { %904 = vrot.lane.b32.xlu0 %v1535_v8, %s2061_s13  ;;  %v670_v28 = vpack.c.bf16 %v669_v26, %v669_v26  ;;  %s396_s13 = scalar_lea.vmem [#allocation13], %s1517_s20 }
 0x389   : > { %s1393_s30 = sshll.u32 %s396_s13, 4  ;;  %s2432_s30 = int_to_ptr.vmem [resolvable:$true] %s1393_s30 }
 0x38a   : > { %1634 = vmatmul.mubr.msk.bf16.vlgmr.msra.gmra.mrb[8].mxu0 %vm612_vm3, %v670_v28  ;;  %s1959_s23 = scalar_lea.vmem %s2432_s30, 128  ;;  %p1966_p2 = scmp.lt.s32.totalorder %s2432_s30, %s1964_s27 }
 0x38b   : > { %1644 = vmatpush3.bf16.msra.mxu0 %v794_v29  ;;  %1645 = vmatprep.mubr.msk.bf16.mxu0 %vm2060_vm0, %v2059_v0  ;;  %p1960_p1 = scmp.ne.s32.totalorder %s2432_s30, %s1959_s23  ;;  %p1967_p3 = scmp.lt.s32.totalorder %s1965_s25, %s1959_s23 }
 0x38c   : > { %1655 = vmatprep.subr.bf16.mxu0 %v2059_v0 }
 0x38d   : > { %p1961_p11 = pnand %p1960_p1, %p2516_p10  ;;  %p1968_p5 = por %p1967_p3, %p1966_p2 }
 0x38f   : > { %p1962_p0 = pneg %p1961_p11 }
 0x391   : > { %p1969_p6 = pnand %p1968_p5, %p1962_p0 }
 0x3ef   : > { %v781_v30 = vpop.xlane.xlu0 %780 }
 0x3f0   : > { %1835 = vrcp.f32 %v781_v30 }
 0x3f7   : > { %v900_v31 = vpop.xlane.xlu1 %899 }
 0x3f8   : > { %1837 = vrcp.f32 %v900_v31  ;;  %v1545_v31 = vld [vmem:[#allocation11 + $0x5] ss:$0 sm:$0xff] }
 0x3fa   : > { %v1836_v32 = vpop.eup %1835 }
 0x3fb   : > { %v783_v33 = vmul.f32 %v1836_v32, %v1828_v15  ;;  %v1021_v40 = vpop.permute.xlu1 %1020 }
 0x3fc   : > { %v1026_v42 = vsel %vm674_vm4, %v1021_v40, 0 }
 0x3fd   : > { %v784_v34 = vpack.c.bf16 %v783_v33, %v783_v33  ;;  %v1546_v33 = vld [vmem:[#allocation11 + $0x6] ss:$0 sm:$0xff] }
 0x3ff   : > { %1646 = vmatmul.mubr.msk.bf16.vlgmr.msra.gmra.mrb[12].mxu0 %vm612_vm3, %v784_v34  ;;  %v1016_v35 = vpop.xlane.xlu0 %1015 }
 0x400   : > { %1839 = vrcp.f32 %v1016_v35  ;;  %1657 = vmatprep.mubr.msk.bf16.mxu0 %vm2060_vm0, %v2059_v0 }
 0x402   : > { %v1838_v36 = vpop.eup %1837 }
 0x403   : > { %v902_v37 = vmul.f32 %v1838_v36, %v1830_v20  ;;  %v905_v38 = vpop.permute.xlu0 %904  ;;  %v1822_v20 = vld [vmem:[%s2484_s6 + $0x8] sm:$0xff]  }
 0x404   : > { %v910_v39 = vsel %vm674_vm4, %v905_v38, 0  ;;  %v1824_v38 = vld [vmem:[%s2484_s6 + $0x18] sm:$0xff]  }
 0x405   : > { %1656 = vmatpush3.bf16.msra.mxu0 %v910_v39  ;;  %v903_v41 = vpack.c.bf16 %v902_v37, %v902_v37  ;;  %v1823_v37 = vld [vmem:[%s2484_s6 + $0x10] sm:$0xff]   ;;  %v1547_v39 = vld [vmem:[%s2485_s7] ss:$0 sm:$0xff] }
 0x406   : > { %1667 = vmatprep.subr.bf16.mxu0 %v2059_v0 }
 0x408   : > { %1658 = vmatmul.mubr.msk.bf16.vlgmr.msra.gmra.mrb[16].mxu0 %vm612_vm3, %v903_v41 }
 0x409   : > { %1668 = vmatpush3.bf16.msra.mxu0 %v1026_v42  ;;  %1669 = vmatprep.mubr.msk.bf16.mxu0 %vm2060_vm0, %v2059_v0 }
 0x40a   : > { %v1840_v43 = vpop.eup %1839  ;;  %1681 = vmatprep.subr.bf16.mxu0 %v2059_v0 }
 0x40b   : > { %v1018_v44 = vmul.f32 %v1840_v43, %v1832_v22 }
 0x40d   : > { %v1019_v45 = vpack.c.bf16 %v1018_v44, %v1018_v44 }
 0x410   : > { %1670 = vmatmul.mubr.msk.bf16.vlgmr.msra.gmra.mrb[20].mxu0 %vm612_vm3, %v1019_v45 }
 0x411   : > { %1685 = vmatprep.mubr.msk.bf16.mxu0 %vm2060_vm0, %v2059_v0  ;;  %1682 = vmatpush3.bf16.msra.mxu0 %v1819_v17 }
 0x412   : > { %1683 = vmatprep.subr.bf16.mxu0 %v2059_v0 }
 0x415   : > { %1684 = vmatpush3.bf16.msra.mxu0 %v1820_v18 }
 0x45d   : > { %v712_v46 = vpop.f32.mrb[8].mxu0 }
 0x45e   : > { %718 = vst.msk [vmem:[#allocation4] sm:$0xff] %vm612_vm3, %v712_v46  ;;  %v1635_v47 = vpop.f32.mrb[9].mxu0 }
 0x45f   : > { %v715_v48 = vpop.f32.mrb[10].mxu0  ;;  %v1551_v47 = vld [vmem:[#allocation11 + $0x4] ss:$0 sm:$0xff] }
 0x460   : > { %v1636_v49 = vpop.f32.mrb[11].mxu0 }
 0x4d2   : > { %v830_v50 = vpop.f32.mrb[12].mxu0 }
 0x4d3   : > { %837 = vrot.lane.b32.xlu1 %v830_v50, %s2064_s16  ;;  %v1647_v51 = vpop.f32.mrb[13].mxu0 }
 0x4d4   : > { %v833_v52 = vpop.f32.mrb[14].mxu0 }
 0x4d5   : > { %v1648_v53 = vpop.f32.mrb[15].mxu0 }
 0x4db   : > { %v946_v56 = vpop.f32.mrb[16].mxu0 }
 0x4dc   : > { %953 = vrot.lane.b32.xlu0 %v946_v56, %s2065_s26  ;;  %v1659_v57 = vpop.f32.mrb[17].mxu0  ;;  %s2430_s26 = scalar_lea.hbm %s2487_s9, %s1562_s28 }
 0x4dd   : > { %v949_v58 = vpop.f32.mrb[18].mxu0 }
 0x4de   : > { %v1660_v59 = vpop.f32.mrb[19].mxu0 }
 0x4e3   : > { %v1062_v60 = vpop.f32.mrb[20].mxu0 }
 0x4e4   : > { %1069 = vrot.lane.b32.xlu1 %v1062_v60, %s2066_s29  ;;  %v1671_v61 = vpop.f32.mrb[21].mxu0  ;;  %s1379_s29 = scalar_lea.sflag [#allocation7], %s394_s15 }
 0x4e5   : > { %v1065_v62 = vpop.f32.mrb[22].mxu0 }
 0x4e6   : > { %v1672_v63 = vpop.f32.mrb[23].mxu0 }
 0x545   : > { %v838_v1 = vpop.permute.xlu1 %837 }
 0x546   : > { %841 = vst.msk [vmem:[#allocation4] sm:$0xff] %vm840_vm5, %v838_v1 }
 0x54e   : > { %v954_v2 = vpop.permute.xlu0 %953 }
 0x54f   : > { %957 = vst.msk [vmem:[#allocation4] sm:$0xff] %vm956_vm6, %v954_v2 }
 0x556   : > { %v1070_v4 = vpop.permute.xlu1 %1069 }
 0x557   : > { %1073 = vst.msk [vmem:[#allocation4] sm:$0xff] %vm1072_vm7, %v1070_v4  ;;  %v1557_v4 = vld [vmem:[#allocation11 + $0x7] ss:$0 sm:$0xff] }
 0x55e   : > { %v1074_v5 = vld [vmem:[#allocation4] sm:$0xff] }
 0x55f   : > { %v1075_v6 = vpack.c.bf16 %v1074_v5, %v1074_v5 }
 0x561   : > { %1678 = vmatmul.mubr.msk.bf16.vlgmr.msra.gmra.mrb[20].mxu1 %vm429_vm1, %v1075_v6  ;;  %v1558_v6 = vld [vmem:[#allocation11 + $0x8] ss:$0 sm:$0xff] }
 0x562   : > { %1697 = vmatprep.mubr.msk.bf16.mxu1 %vm2060_vm0, %v2059_v0  ;;  %1690 = vmatpush3.bf16.msra.mxu1 %v1821_v19 }
 0x563   : > { %1691 = vmatprep.subr.bf16.mxu1 %v2059_v0 }
 0x566   : > { %1692 = vmatpush3.bf16.msra.mxu1 %v1822_v20 }
 0x567   : > { %1693 = vmatprep.subr.bf16.mxu1 %v2059_v0 }
 0x56a   : > { %1694 = vmatpush3.bf16.msra.mxu1 %v1823_v37 }
 0x56b   : > { %1695 = vmatprep.subr.bf16.mxu1 %v2059_v0 }
 0x56e   : > { %1696 = vmatpush3.bf16.msra.mxu1 %v1824_v38 }
 0x634   : > { %v1134_v8 = vpop.f32.mrb[20].mxu1 }
 0x635   : > { %v1135_v9 = vadd.f32 %v1541_v7, %v1134_v8  ;;  %v1679_v10 = vpop.f32.mrb[21].mxu1 }
 0x636   : > { %v1137_v11 = vpop.f32.mrb[22].mxu1 }
 0x637   : > { %v1140_v12 = vadd.f32 %v1135_v9, %v2307_v3  ;;  %v1680_v13 = vpop.f32.mrb[23].mxu1 }
 0x639   : > { %v1143_v14 = vsel %vm429_vm1, %v1140_v12, 0.0  ;;  %v1147_v15 = vmul.f32 %v1140_v12, %v1140_v12 }
 0x63a   : > { %1144 = vadd.xlane.f32.xlu0 %v1143_v14 }
 0x63b   : > { %v1148_v16 = vsel %vm429_vm1, %v1147_v15, 0.0 }
 0x63c   : > { %1149 = vadd.xlane.f32.xlu1 %v1148_v16 }
 0x6c7   : > { %v1145_v21 = vpop.xlane.xlu0 %1144 }
 0x6c8   : > { %v1146_v22 = vmul.f32 0.03125, %v1145_v21 }
 0x6c9   : > { %v1150_v23 = vpop.xlane.xlu1 %1149 }
 0x6ca   : > { %v1152_v24 = vmul.f32 %v1146_v22, %v1146_v22  ;;  %v1151_v25 = vmul.f32 0.03125, %v1150_v23  ;;  %v1155_v29 = vsub.f32 %v1140_v12, %v1146_v22  ;;  %v1559_v22 = vld [vmem:[#allocation11 + $0x9] ss:$0 sm:$0xff] }
 0x6cc   : > { %v1153_v26 = vsub.f32 %v1151_v25, %v1152_v24  ;;  %v1560_v24 = vld [vmem:[#allocation11 + $0xa] ss:$0 sm:$0xff] }
 0x6ce   : > { %v1154_v27 = vmax.f32 %v1153_v26, 0.0 }
 0x6d0   : > { %v1156_v28 = vadd.f32 1e-05, %v1154_v27 }
 0x6d2   : > { %1841 = vrsqrt.f32 %v1156_v28 }
 0x6dc   : > { %v1842_v30 = vpop.eup %1841 }
 0x6dd   : > { %v1158_v32 = vmul.f32 %v1842_v30, %v1155_v29 }
 0x6df   : > { %v1163_v34 = vmul.f32 %v1545_v31, %v1158_v32 }
 0x6e1   : > { %v1168_v35 = vadd.f32 %v1546_v33, %v1163_v34 }
 0x6e3   : > { %v1169_v36 = vpack.c.bf16 %v1168_v35, %v1168_v35 }
 0x6e5   : > { %1686 = vmatmul.mubr.msk.bf16.vlgmr.msra.gmra.mrb[24].mxu0 %vm429_vm1, %v1169_v36 }
 0x7b8   : > { %v1230_v40 = vpop.f32.mrb[24].mxu0 }
 0x7b9   : > { %v1231_v41 = vadd.f32 %v1547_v39, %v1230_v40  ;;  %v1687_v42 = vpop.f32.mrb[25].mxu0 }
 0x7ba   : > { %v1233_v43 = vpop.f32.mrb[26].mxu0 }
 0x7bb   : > { %v1236_v44 = vmax.f32 %v1231_v41, 0.0  ;;  %v1688_v45 = vpop.f32.mrb[27].mxu0 }
 0x7bd   : > { %v1237_v46 = vpack.c.bf16 %v1236_v44, %v1236_v44 }
 0x7bf   : > { %1698 = vmatmul.mubr.msk.bf16.vlgmr.msra.gmra.mrb[24].mxu1 %vm1275_vm8, %v1237_v46 }
 0x892   : > { %v1313_v0 = vpop.f32.mrb[24].mxu1 }
 0x893   : > { %v1314_v48 = vadd.f32 %v1551_v47, %v1313_v0  ;;  %v1699_v49 = vpop.f32.mrb[25].mxu1 }
 0x894   : > { %v1316_v50 = vpop.f32.mrb[26].mxu1 }
 0x895   : > { %v1319_v51 = vadd.f32 %v1314_v48, %v1168_v35  ;;  %v1700_v52 = vpop.f32.mrb[27].mxu1 }
 0x897   : > { %v1322_v53 = vsel %vm429_vm1, %v1319_v51, 0.0  ;;  %v1326_v54 = vmul.f32 %v1319_v51, %v1319_v51 }
 0x898   : > { %1323 = vadd.xlane.f32.xlu0 %v1322_v53 }
 0x899   : > { %v1327_v55 = vsel %vm429_vm1, %v1326_v54, 0.0 }
 0x89c   : > { %1328 = vadd.xlane.f32.xlu0 %v1327_v55 }
 0x925   : > { %v1324_v56 = vpop.xlane.xlu0 %1323 }
 0x926   : > { %v1325_v57 = vmul.f32 0.03125, %v1324_v56 }
 0x928   : > { %v1331_v59 = vmul.f32 %v1325_v57, %v1325_v57  ;;  %v1334_v1 = vsub.f32 %v1319_v51, %v1325_v57 }
 0x929   : > { %v1329_v58 = vpop.xlane.xlu0 %1328 }
 0x92a   : > { %v1330_v60 = vmul.f32 0.03125, %v1329_v58 }
 0x92c   : > { %v1332_v61 = vsub.f32 %v1330_v60, %v1331_v59 }
 0x92e   : > { %v1333_v62 = vmax.f32 %v1332_v61, 0.0 }
 0x930   : > { %v1335_v63 = vadd.f32 1e-05, %v1333_v62 }
 0x932   : > { %1843 = vrsqrt.f32 %v1335_v63 }
 0x93c   : > { %v1844_v2 = vpop.eup %1843 }
 0x93d   : > { %v1337_v5 = vmul.f32 %v1844_v2, %v1334_v1 }
 0x93f   : > { %v1342_v7 = vmul.f32 %v1557_v4, %v1337_v5 }
 0x941   : > { %v1347_v8 = vadd.f32 %v1558_v6, %v1342_v7 }
 0x943   : > { %v1350_v9 = vsel %vm429_vm1, %v1347_v8, 0.0  ;;  %v1354_v10 = vmul.f32 %v1347_v8, %v1347_v8 }
 0x944   : > { %1351 = vadd.xlane.f32.xlu1 %v1350_v9 }
 0x945   : > { %v1355_v11 = vsel %vm429_vm1, %v1354_v10, 0.0 }
 0x946   : > { %1356 = vadd.xlane.f32.xlu0 %v1355_v11 }
 0x9d1   : > { %v1352_v12 = vpop.xlane.xlu1 %1351 }
 0x9d2   : > { %v1353_v13 = vmul.f32 0.03125, %v1352_v12 }
 0x9d3   : > { %v1357_v14 = vpop.xlane.xlu0 %1356 }
 0x9d4   : > { %v1359_v15 = vmul.f32 %v1353_v13, %v1353_v13  ;;  %v1358_v16 = vmul.f32 0.03125, %v1357_v14  ;;  %v1362_v20 = vsub.f32 %v1347_v8, %v1353_v13 }
 0x9d6   : > { %v1360_v17 = vsub.f32 %v1358_v16, %v1359_v15 }
 0x9d8   : > { %v1361_v18 = vmax.f32 %v1360_v17, 0.0 }
 0x9da   : > { %v1363_v19 = vadd.f32 1e-06, %v1361_v18 }
 0x9dc   : > { %1845 = vrsqrt.f32 %v1363_v19 }
 0x9e6   : > { %v1846_v21 = vpop.eup %1845 }
 0x9e7   : > { %v1365_v23 = vmul.f32 %v1846_v21, %v1362_v20 }
 0x9e9   : > { %v1370_v25 = vmul.f32 %v1559_v22, %v1365_v23 }
 0x9eb   : > { %v1375_v26 = vadd.f32 %v1560_v24, %v1370_v25 }
 0x9ed   : > { %v1376_v27 = vadd.f32 %v1375_v26, %v2307_v3 }
 0x9ef   : > { %1377 = vst.msk [vmem:[%s396_s13] sm:$0xff] %vm429_vm1, %v1376_v27 }
 0x9f0   : > { %1972 = shalt.err (!%p1969_p6)
}
 0x9f1   : > { %s1973_s24 = scalar_lea.hbm %s2430_s26, 128  ;;  %s1977_s14 = scalar_lea.hbm %s2487_s9, 256 }
 0x9f2   : > { %p1974_p7 = scmp.ne.s32.totalorder %s2430_s26, %s1973_s24  ;;  %p1978_p4 = scmp.lt.u32.totalorder %s2430_s26, %s2487_s9 }
 0x9f3   : > { %p1979_p8 = scmp.lt.u32.totalorder %s1977_s14, %s1973_s24  ;;  %p1981_p1 = scmp.lt.u32.totalorder %s1973_s24, %s2430_s26 }
 0x9f4   : > { %p1975_p9 = pnand %p1974_p7, %p2516_p10 }
 0x9f5   : > { %p1980_p13 = por %p1979_p8, %p1978_p4 }
 0x9f6   : > { %p1976_p12 = pneg %p1975_p9 }
 0x9f7   : > { %p1982_p11 = por %p1981_p1, %p1980_p13 }
 0x9f9   : > { %p1983_p0 = pnand %p1982_p11, %p1976_p12 }
 0x9fb   : > { %1986 = shalt.err (!%p1983_p0)
}
 0x9fc   : > { %1717 = dma.vmem_to_hbm [thread:$0]  (%p2516_p10), %s2432_s30, 128, %s2430_s26, %s1379_s29  }
 0x9fd PF: > { %s2517_s22 = sld [smem:[#allocation21_spill]]  ;;  %s2518_s15 = sld [smem:[#allocation18_spill]] }
 0x9fe   : > { %s2519_s20 = sld [smem:[#allocation23_spill]] }
 0xa03   : > { %p1744_p2 = scmp.ge.s32.totalorder %s2517_s22, 2  ;;  %s1405_s28 = sand.u32 1, %s2518_s15  }
 0xa04   : > { %p2520_p3 = scmp.ne.s32.totalorder %s2519_s20, 0  ;;  %s1406_s13 = scalar_lea.sflag [#allocation7], %s1405_s28 }
 0xa06   : > { %p1733_p5 = pnand %p1744_p2, %p2520_p3 }
 0xa08   : > { %2024 = dma.done.wait (!%p1733_p5), %s1406_s13, 128  }
 0xa09   : > { %2026 = vsyncadd (!%p1733_p5), %s1406_s13, 4294967168  ;;  %s25_s14 = sadd.s32 1, %s2517_s22   ;;  %s2521_s17 = sld [smem:[#allocation19_spill]] }
 0xa0a   : > { %p22_p6 = scmp.ge.s32.totalorder %s25_s14, 4   ;;  %s2522_s11 = sld [smem:[#allocation24_spill]] }
 0xa0b   : > { %s2523_s12 = sld [smem:[#allocation20_spill]]  ;;  %s2524_s13 = sld [smem:[#allocation22_spill]] }
 0xa0c   : > { %s2525_s30 = smov %s2033_s10  ;;  %24 = sbr.rel (!%p22_p6) target bundleno = 9 (0x9), region = 113 }
 0xa0f   : > { %s2526_s10 = smov %s2521_s17 }
 0xa13   :  { %1411 = vsyncpa [#allocation6], 1 }
 0xa14   :  { %1413 = vsyncpa [#allocation6 + $0x1], 1 }
 0xa15   :  { %1414 = vsyncpa [#allocation9], 1 }
 0xa16   :  { %1415 = vsyncpa [#allocation12], 1 }
 0xa17   :  { %1416 = vsyncpa [#allocation7], 1 }
 0xa18   :  { %1418 = vsyncpa [#allocation7 + $0x1], 1 }

// kernel: tpu_custom_call.1
= control target key start
LH: loop header
LB: loop body
LE: loop exit
PB: predicated region body
PF: predicated region fallthrough
CT: control target
= control target key end

     0   :  { %s2478_s0 = inlined_call_operand.vmem [shape: f32[2,8,32], index: 0, kind: input, shape index: {}]   ;;  %s2479_s1 = inlined_call_operand.vmem [shape: bf16[32,32], index: 1, kind: input, shape index: {}]   ;;  %s2480_s2 = inlined_call_operand.vmem [shape: bf16[32,32], index: 2, kind: input, shape index: {}]   ;;  %s2481_s3 = inlined_call_operand.hbm [shape: bf16[32,32], index: 3, kind: input, shape index: {}]   ;;  %s2482_s4 = inlined_call_operand.hbm [shape: bf16[32,32], index: 4, kind: input, shape index: {}]   ;;  %s2483_s5 = inlined_call_operand.hbm [shape: bf16[32,64], index: 5, kind: input, shape index: {}]   ;;  %s2484_s6 = inlined_call_operand.vmem [shape: bf16[64,32], index: 6, kind: input, shape index: {}]   ;;  %s2485_s7 = inlined_call_operand.vmem [shape: f32[1,64], index: 7, kind: input, shape index: {}]   ;;  %s2486_s8 = inlined_call_operand.hbm [shape: f32[11,32], index: 8, kind: input, shape index: {}]   ;;  %s2487_s9 = inlined_call_operand.hbm [shape: f32[2,8,32], index: 9, kind: output, shape index: {}]  }
   0x1   :  { %2499 = sst [smem:[#allocation25_spill]] %s2482_s4 }
   0x2   :  { %14 = vsyncpa [#allocation6], 0 }
   0x3   :  { %15 = vsyncpa [#allocation9], 0 }
   0x4   :  { %16 = vsyncpa [#allocation12], 0 }
   0x5   :  { %17 = vsyncpa [#allocation7], 0 }
   0x6   :  { %19 = vsyncpa [#allocation7 + $0x1], 0  ;;  %s2118_s30 = smov 0   ;;  %s2120_s10 = smov 0  }
   0x7   :  { %s2122_s11 = smov 0   ;;  %s2124_s12 = smov 0  }
   0x8   :  { %s2126_s13 = smov 0   ;;  %s2128_s14 = smov 0  }
   0x9 LB: > { %2500 = sst [smem:[#allocation18_spill]] %s2029_s30  ;;  %s1504_s15 = sadd.s32 4294967295, %s2049_s14   ;;  %s2049_s14 = sphi %s2128_s14, %s25_s14   ;;  %s2045_s13 = sphi %s2126_s13, %s2524_s13   ;;  %s2041_s12 = sphi %s2124_s12, %s2523_s12   ;;  %s2037_s11 = sphi %s2122_s11, %s2522_s11   ;;  %s2033_s10 = sphi %s2120_s10, %s2526_s10   ;;  %s2029_s30 = sphi %s2118_s30, %s2525_s30  }
   0xa   : > { %2501 = sst [smem:[#allocation19_spill]] %s2037_s11  ;;  %s1505_s16 = sadd.s32 4294967294, %s2049_s14  }
   0xb   : > { %2502 = sst [smem:[#allocation20_spill]] %s2045_s13  ;;  %s37_s17 = sadd.s32 1, %s2045_s13 }
   0xc   : > { %2503 = sst [smem:[#allocation21_spill]] %s2049_s14  ;;  %s240_s18 = sadd.s32 1, %s2037_s11 }
   0xd   : > { %p39_p0 = scmp.ge.s32.totalorder %s37_s17, 2  ;;  %p250_p1 = scmp.ne.s32.totalorder %s2037_s11, %s2033_s10 }
   0xe   : > { %p251_p2 = scmp.eq.s32.totalorder %s1504_s15, 1  ;;  %p256_p3 = scmp.ne.s32.totalorder %s2033_s10, %s2029_s30 }
   0xf   : > { %s2528_s17 = smov (%p39_p0, %s37_s17), 0  ;;  %p257_p5 = scmp.eq.s32.totalorder %s1505_s16, 1 }
  0x10   : > { %2504 = sst [smem:[#allocation22_spill]] %s2528_s17  ;;  %p2158_p4 = por %p251_p2, %p250_p1 }
  0x11   : > { %s235_s20 = ssub.s32 %s2045_s13, %s2528_s17  ;;  %p1506_p6 = scmp.ge.s32.totalorder %s2049_s14, 1 }
  0x12   : > { %s2505_s19 = scalar_select %p2158_p4, 1, 0 }
  0x13   : > { %p238_p7 = scmp.eq.s32.totalorder %s235_s20, 0  ;;  %p2165_p8 = por %p257_p5, %p256_p3 }
  0x14   : > { %p264_p9 = scmp.lt.s32.totalorder %s2049_s14, 3  ;;  %p2177_p11 = scmp.eq.s32.totalorder %s1504_s15, 0 }
  0x15   : > { %s2506_s21 = scalar_select %p2165_p8, 1, 0 }
  0x16   : > { %s2171_s22 = scalar_select %p238_p7, %s2037_s11, %s240_s18  }
  0x17   : > { %2507 = sst [smem:[#allocation23_spill]] %s2506_s21  ;;  %p2173_p10 = pnand %p1506_p6, %p264_p9 }
  0x18   : > { %2508 = sst [smem:[#allocation24_spill]] %s2171_s22  ;;  %s2051_s25 = smov [#allocation8]  }
  0x19   : > { %s2509_s23 = scalar_select %p2173_p10, 1, 0 }
  0x1a   : > { %s2510_s24 = scalar_select %p2177_p11, 1, 0 }
  0x1b   : > { %p1719_p12 = pneg %p2173_p10  ;;  %s295_s26 = sshll.u32 %s2051_s25, 4  ;;  %s296_s26 = int_to_ptr.vmem [resolvable:$true] %s295_s26 }
  0x1c   : > { %s2052_s28 = smov [#allocation5]   ;;  %s2512_s4 = sld [smem:[#allocation25_spill]] }
  0x1d   : > { %p2185_p13 = pnand %p2177_p11, %p1719_p12  ;;  %s282_s29 = sshll.u32 %s2052_s28, 4  ;;  %s283_s29 = int_to_ptr.vmem [resolvable:$true] %s282_s29 }
  0x1f   : > { %p2197_p1 = pneg %p2185_p13 }
  0x22   : > { %s1847_s15 = scalar_lea.hbm %s2512_s4, 256 }
  0x23   : > { %p1848_p0 = scmp.ne.s32.totalorder %s2512_s4, %s1847_s15  ;;  %p1854_p5 = scmp.lt.u32.totalorder %s1847_s15, %s2512_s4 }
  0x25   : > { %p1850_p2 = pnand %p2197_p1, %p1848_p0 }
  0x27   : > { %p1851_p3 = pneg %p1850_p2 }
  0x29   : > { %p1856_p6 = pnand %p1854_p5, %p1851_p3 }
  0x2b   : > { %1859 = shalt.err (!%p1856_p6)
}
  0x2c   : > { %s1860_s28 = scalar_lea.vmem %s296_s26, 256  ;;  %p1868_p8 = scmp.lt.s32.totalorder %s296_s26, %s296_s26 }
  0x2d   : > { %p1861_p7 = scmp.ne.s32.totalorder %s296_s26, %s1860_s28  ;;  %p1869_p4 = scmp.lt.s32.totalorder %s1860_s28, %s1860_s28 }
  0x2f   : > { %p1863_p9 = pnand %p1861_p7, %p2197_p1  ;;  %p1870_p11 = por %p1869_p4, %p1868_p8 }
  0x31   : > { %p1864_p12 = pneg %p1863_p9 }
  0x33   : > { %p1871_p10 = pnand %p1870_p11, %p1864_p12 }
  0x35   : > { %1874 = shalt.err (!%p1871_p10)
}
  0x36   : > { %s2053_s17 = smov 64   ;;  %s2054_s16 = smov 4  }
  0x37   : > { %1725 = dma.hbm_to_vmem [thread:$0]  (!%p2185_p13), %s2512_s4, 256, %s296_s26, [#allocation9], %s2053_s17, %s2053_s17, %s2054_s16  }
  0x38   : > { %s1875_s20 = scalar_lea.hbm %s2481_s3, 256 }
  0x39   : > { %p1876_p4 = scmp.ne.s32.totalorder %s2481_s3, %s1875_s20  ;;  %p1882_p11 = scmp.lt.u32.totalorder %s1875_s20, %s2481_s3 }
  0x3b   : > { %p1878_p8 = pnand %p1876_p4, %p2197_p1 }
  0x3d   : > { %p1879_p10 = pneg %p1878_p8 }
  0x3f   : > { %p1884_p0 = pnand %p1882_p11, %p1879_p10 }
  0x41   : > { %1887 = shalt.err (!%p1884_p0)
}
  0x42   : > { %s1888_s13 = scalar_lea.vmem %s283_s29, 256  ;;  %p1896_p6 = scmp.lt.s32.totalorder %s283_s29, %s283_s29 }
  0x43   : > { %p1889_p2 = scmp.ne.s32.totalorder %s283_s29, %s1888_s13  ;;  %p1897_p7 = scmp.lt.s32.totalorder %s1888_s13, %s1888_s13 }
  0x45   : > { %p1891_p3 = pnand %p1889_p2, %p2197_p1  ;;  %p1898_p9 = por %p1897_p7, %p1896_p6 }
  0x47   : > { %p1892_p5 = pneg %p1891_p3 }
  0x49   : > { %p1899_p12 = pnand %p1898_p9, %p1892_p5 }
  0x4b   : > { %1902 = shalt.err (!%p1899_p12)
}
  0x4c   : > { %1722 = dma.hbm_to_vmem [thread:$0]  (!%p2185_p13), %s2481_s3, 256, %s283_s29, [#allocation6], %s2053_s17, %s2053_s17, %s2054_s16  }
  0x4d   : > { %s2055_s21 = smov [#allocation10]   ;;  %s2056_s22 = smov [#allocation11]  }
  0x4e   : > { %s308_s26 = sshll.u32 %s2055_s21, 4  ;;  %s327_s18 = sshll.u32 %s2056_s22, 4  ;;  %s309_s26 = int_to_ptr.vmem [resolvable:$true] %s308_s26  ;;  %s328_s18 = int_to_ptr.vmem [resolvable:$true] %s327_s18 }
  0x4f   : > { %s1903_s28 = scalar_lea.hbm %s2483_s5, 256 }
  0x50   : > { %p1904_p4 = scmp.ne.s32.totalorder %s2483_s5, %s1903_s28  ;;  %p1910_p11 = scmp.lt.u32.totalorder %s1903_s28, %s2483_s5 }
  0x52   : > { %p1906_p8 = pnand %p1904_p4, %p2197_p1 }
  0x54   : > { %p1907_p10 = pneg %p1906_p8 }
  0x56   : > { %p1912_p0 = pnand %p1910_p11, %p1907_p10 }
  0x58   : > { %1915 = shalt.err (!%p1912_p0)
}
  0x59   : > { %s1916_s29 = scalar_lea.vmem %s309_s26, 256  ;;  %p1924_p6 = scmp.lt.s32.totalorder %s309_s26, %s309_s26 }
  0x5a   : > { %p1917_p2 = scmp.ne.s32.totalorder %s309_s26, %s1916_s29  ;;  %p1925_p7 = scmp.lt.s32.totalorder %s1916_s29, %s1916_s29 }
  0x5c   : > { %p1919_p3 = pnand %p1917_p2, %p2197_p1  ;;  %p1926_p9 = por %p1925_p7, %p1924_p6 }
  0x5e   : > { %p1920_p5 = pneg %p1919_p3 }
  0x60   : > { %p1927_p12 = pnand %p1926_p9, %p1920_p5 }
  0x62   : > { %1930 = shalt.err (!%p1927_p12)
}
  0x63   : > { %1728 = dma.hbm_to_vmem [thread:$0]  (!%p2185_p13), %s2483_s5, 256, %s309_s26, [#allocation9], %s2053_s17, %s2053_s17, %s2054_s16  }
  0x64   : > { %s1931_s22 = scalar_lea.hbm %s2486_s8, 256 }
  0x65   : > { %p1932_p4 = scmp.ne.s32.totalorder %s2486_s8, %s1931_s22  ;;  %p1938_p11 = scmp.lt.u32.totalorder %s1931_s22, %s2486_s8 }
  0x67   : > { %p1934_p8 = pnand %p1932_p4, %p2197_p1 }
  0x69   : > { %p1935_p10 = pneg %p1934_p8 }
  0x6b   : > { %p1940_p0 = pnand %p1938_p11, %p1935_p10 }
  0x6d   : > { %1943 = shalt.err (!%p1940_p0)
}
  0x6e   : > { %s1944_s30 = scalar_lea.vmem %s328_s18, 256  ;;  %p1952_p6 = scmp.lt.s32.totalorder %s328_s18, %s328_s18 }
  0x6f   : > { %p1945_p2 = scmp.ne.s32.totalorder %s328_s18, %s1944_s30  ;;  %p1953_p7 = scmp.lt.s32.totalorder %s1944_s30, %s1944_s30 }
  0x71   : > { %p1947_p3 = pnand %p1945_p2, %p2197_p1  ;;  %p1954_p9 = por %p1953_p7, %p1952_p6 }
  0x73   : > { %p1948_p5 = pneg %p1947_p3 }
  0x75   : > { %p1955_p12 = pnand %p1954_p9, %p1948_p5 }
  0x77   : > { %1958 = shalt.err (!%p1955_p12)
}
  0x78   : > { %s2057_s17 = smov 128   ;;  %s2058_s16 = smov 8  }
  0x79   : > { %1731 = dma.hbm_to_vmem [thread:$0]  (!%p2185_p13), %s2486_s8, 256, %s328_s18, [#allocation12], %s2057_s17, %s2057_s17, %s2058_s16  }
  0x7a   : > { %p2514_p4 = scmp.ne.s32.totalorder %s2509_s23, 0 }
  0x7b   : > { %p2515_p8 = scmp.ne.s32.totalorder (!%p2514_p4), %s2510_s24, 0 }
  0x7c   : > { %350 = sbr.rel (%p2514_p4) target bundleno = 2557 (0x9fd), region = 56 }
  0x83   : > { %2012 = dma.done.wait (%p2515_p8), [#allocation6], 256  }
  0x84   : > { %2014 = vsyncadd (%p2515_p8), [#allocation6], 4294967040 }
  0x85   : > { %2016 = dma.done.wait (%p2515_p8), [#allocation9], 512  }
  0x86   : > { %2018 = vsyncadd (%p2515_p8), [#allocation9], 4294966784 }
  0x87   : > { %2020 = dma.done.wait (%p2515_p8), [#allocation12], 256  }
  0x88   : > { %2022 = vsyncadd (%p2515_p8), [#allocation12], 4294967040  ;;  %p397_p13 = scmp.lt.s32.totalorder %s2041_s12, 1  ;;  %v2059_v0 = vmov 0.0   ;;  %vm2060_vm0 = vmmov 0   ;;  %v1809_v1 = vld [vmem:[%s2480_s2] sm:$0xff]  }
  0x89   : > { %1601 = vmatprep.subr.bf16.mxu0 %v2059_v0  ;;  %1605 = vmatprep.mubr.msk.bf16.mxu0 %vm2060_vm0, %v2059_v0  ;;  %v1810_v2 = vld [vmem:[%s2480_s2 + $0x8] sm:$0xff]   ;;  %vm429_vm1 = vcmask 261120   ;;  %v1811_v4 = vld [vmem:[%s2479_s1] sm:$0xff]   ;;  %v1813_v7 = vld [vmem:[#allocation5] sm:$0xff]   ;;  %vm535_vm2 = vcmask 257024   ;;  %vm612_vm3 = vcmask 64512  }
  0x8a   : > { %s398_s23 = scalar_select %p397_p13, %s2041_s12, 1  ;;  %1609 = vmatprep.subr.bf16.mxu1 %v2059_v0  ;;  %1613 = vmatprep.mubr.msk.bf16.mxu1 %vm2060_vm0, %v2059_v0  ;;  %v1812_v6 = vld [vmem:[%s2479_s1 + $0x8] sm:$0xff]   ;;  %v1814_v8 = vld [vmem:[#allocation5 + $0x8] sm:$0xff]   ;;  %v1519_v9 = vld [vmem:[#allocation11 + $0x1] ss:$0 sm:$0xff]  ;;  %vm674_vm4 = vcmask 1043456  }
  0x8b   : > { %1602 = vmatpush3.bf16.msra.mxu0 %v1809_v1  ;;  %1610 = vmatpush3.bf16.msra.mxu1 %v1813_v7  ;;  %v1527_v16 = vld [vmem:[#allocation11] ss:$0 sm:$0xff]  ;;  %s2061_s13 = smov 112   ;;  %s2062_s30 = smov 120   ;;  %v1523_v27 = vld [vmem:[#allocation11 + $0x2] ss:$0 sm:$0xff] }
  0x8c   : > { %s1518_s27 = sshll.u32 %s398_s23, 3  ;;  %1603 = vmatprep.subr.bf16.mxu0 %v2059_v0  ;;  %1611 = vmatprep.subr.bf16.mxu1 %v2059_v0  ;;  %s2063_s17 = smov 104   ;;  %vm840_vm5 = vcmask 130112   ;;  %vm956_vm6 = vcmask 195712   ;;  %vm1072_vm7 = vcmask 261312   ;;  %vm1275_vm8 = vcmask 523264  }
  0x8d   : > { %s400_s18 = scalar_lea.vmem %s2478_s0, %s1518_s27  ;;  %s2064_s16 = smov 8  }
  0x8e   : > { %v2307_v3 = vld [vmem:[%s400_s18] sm:$0xff]  ;;  %s2065_s26 = smov 16   ;;  %s2066_s29 = smov 24  }
  0x8f   : > { %v407_v5 = vpack.c.bf16 %v2307_v3, %v2307_v3  ;;  %1604 = vmatpush3.bf16.msra.mxu0 %v1810_v2  ;;  %1612 = vmatpush3.bf16.msra.mxu1 %v1814_v8  ;;  %s394_s15 = sand.u32 1, %s2033_s10   ;;  %s1562_s28 = sshll.u32 %s2041_s12, 7 }
  0x90   : > { %1617 = vmatprep.subr.bf16.mxu0 %v2059_v0  ;;  %1625 = vmatprep.subr.bf16.mxu1 %v2059_v0  ;;  %s1517_s20 = sshll.u32 %s394_s15, 3  ;;  %p2516_p10 = scmp.ne.s32.totalorder %s2505_s19, 0 }
  0x91   : > { %s2067_s12 = smov [#allocation13]  }
  0x92   : > { %1606 = vmatmul.mubr.msk.bf16.vlgmr.msra.gmra.mrb[0].mxu0 %vm429_vm1, %v407_v5  ;;  %1614 = vmatmul.mubr.msk.bf16.vlgmr.msra.gmra.mrb[0].mxu1 %vm429_vm1, %v407_v5  ;;  %s1963_s27 = sshll.u32 %s2067_s12, 4  ;;  %s1964_s27 = int_to_ptr.vmem [resolvable:$false] %s1963_s27 }
  0x93   : > { %1618 = vmatpush3.bf16.msra.mxu0 %v1811_v4  ;;  %1621 = vmatprep.mubr.msk.bf16.mxu0 %vm2060_vm0, %v2059_v0  ;;  %s1965_s25 = scalar_lea.vmem %s1964_s27, 256 }
  0x94   : > { %1619 = vmatprep.subr.bf16.mxu0 %v2059_v0  ;;  %1627 = vmatprep.mubr.msk.bf16.mxu1 %vm2060_vm0, %v2059_v0 }
  0x97   : > { %1620 = vmatpush3.bf16.msra.mxu0 %v1812_v6 }
  0x98   : > { %1631 = vmatprep.subr.bf16.mxu0 %v2059_v0 }
  0x9a   : > { %1622 = vmatmul.mubr.msk.bf16.vlgmr.msra.gmra.mrb[4].mxu0 %vm429_vm1, %v407_v5 }
  0x9b   : > { %1633 = vmatprep.mubr.msk.bf16.mxu0 %vm2060_vm0, %v2059_v0 }
 0x165   : > { %v467_v10 = vpop.f32.mrb[0].mxu0  ;;  %v528_v28 = vpop.f32.mrb[0].mxu1 }
 0x166   : > { %v468_v11 = vadd.f32 %v1519_v9, %v467_v10  ;;  %v1607_v12 = vpop.f32.mrb[1].mxu0  ;;  %v529_v29 = vadd.f32 %v1523_v27, %v528_v28  ;;  %v1615_v30 = vpop.f32.mrb[1].mxu1 }
 0x167   : > { %v470_v13 = vpop.f32.mrb[2].mxu0  ;;  %v531_v31 = vpop.f32.mrb[2].mxu1 }
 0x168   : > { %v534_v14 = vpack.c.bf16 %v468_v11, %v468_v11  ;;  %v1608_v15 = vpop.f32.mrb[3].mxu0  ;;  %v537_v32 = vpack.c.bf16 %v529_v29, %v529_v29  ;;  %v1616_v33 = vpop.f32.mrb[3].mxu1 }
 0x16a   : > { %536 = vst.msk [vmem:[#allocation2] sm:$0xf] %vm535_vm2, %v534_v14  ;;  %538 = vst.msk [vmem:[#allocation3] sm:$0xf] %vm535_vm2, %v537_v32 }
 0x16d   : > { %v602_v17 = vpop.f32.mrb[4].mxu0 }
 0x16e   : > { %v603_v18 = vadd.f32 %v1527_v16, %v602_v17  ;;  %v1623_v19 = vpop.f32.mrb[5].mxu0 }
 0x16f   : > { %v605_v20 = vpop.f32.mrb[6].mxu0 }
 0x170   : > { %v608_v21 = vmul.f32 0.35355338, %v603_v18  ;;  %v1624_v22 = vpop.f32.mrb[7].mxu0 }
 0x171   : > { %v609_v23 = vld [vmem:[#allocation2] sm:$0xf]  ;;  %v610_v34 = vld [vmem:[#allocation3] sm:$0xf] }
 0x172   : > { %v617_v24 = vsel %vm612_vm3, %v609_v23, 0  ;;  %v1533_v25 = vcombine.low %v609_v23, %v609_v23  ;;  %v611_v26 = vpack.c.bf16 %v608_v21, %v608_v21  ;;  %v676_v35 = vsel %vm674_vm4, %v610_v34, 0 }
 0x173   : > { %1626 = vmatpush3.bf16.xpose.msra.mxu1 %v617_v24  ;;  %1632 = vmatpush3.bf16.msra.mxu0 %v676_v35  ;;  %v1535_v8 = vcombine.low %v610_v34, %v610_v34 }
 0x174   : > { %844 = vrot.lane.b32.xlu1 %v1533_v25, %s2061_s13  ;;  %725 = vrot.lane.b32.xlu0 %v1533_v25, %s2062_s30 }
 0x175   : > { %1637 = vmatprep.subr.bf16.mxu1 %v2059_v0  ;;  %1643 = vmatprep.subr.bf16.mxu0 %v2059_v0 }
 0x178   : > { %842 = vrot.lane.b32.xlu1 %v611_v26, %s2061_s13  ;;  %720 = vrot.lane.b32.xlu0 %v611_v26, %s2062_s30 }
 0x17a   : > { %1628 = vmatmul.mubr.msk.bf16.vlgmr.msra.gmra.mrb[4].mxu1 %vm612_vm3, %v611_v26 }
 0x17b   : > { %1639 = vmatprep.mubr.msk.bf16.mxu1 %vm2060_vm0, %v2059_v0 }
 0x17c   : > { %958 = vrot.lane.b32.xlu1 %v611_v26, %s2063_s17  ;;  %960 = vrot.lane.b32.xlu0 %v1533_v25, %s2063_s17 }
 0x1e6   : > { %v726_v36 = vpop.permute.xlu0 %725  ;;  %v845_v38 = vpop.permute.xlu1 %844 }
 0x1e7   : > { %v731_v37 = vsel %vm612_vm3, %v726_v36, 0  ;;  %v850_v40 = vsel %vm612_vm3, %v845_v38, 0 }
 0x1e8   : > { %1638 = vmatpush3.bf16.xpose.msra.mxu1 %v731_v37 }
 0x1e9   : > { %1649 = vmatprep.subr.bf16.mxu1 %v2059_v0 }
 0x1ea   : > { %v721_v39 = vpop.permute.xlu0 %720  ;;  %v843_v42 = vpop.permute.xlu1 %842 }
 0x1ee   : > { %v961_v41 = vpop.permute.xlu0 %960  ;;  %v959_v44 = vpop.permute.xlu1 %958 }
 0x1ef   : > { %1640 = vmatmul.mubr.msk.bf16.vlgmr.msra.gmra.mrb[8].mxu1 %vm612_vm3, %v721_v39  ;;  %v966_v43 = vsel %vm612_vm3, %v961_v41, 0 }
 0x1f0   : > { %1650 = vmatpush3.bf16.xpose.msra.mxu1 %v850_v40  ;;  %1651 = vmatprep.mubr.msk.bf16.mxu1 %vm2060_vm0, %v2059_v0 }
 0x1f1   : > { %1661 = vmatprep.subr.bf16.mxu1 %v2059_v0 }
 0x1f7   : > { %1652 = vmatmul.mubr.msk.bf16.vlgmr.msra.gmra.mrb[12].mxu1 %vm612_vm3, %v843_v42 }
 0x1f8   : > { %1662 = vmatpush3.bf16.xpose.msra.mxu1 %v966_v43  ;;  %1663 = vmatprep.mubr.msk.bf16.mxu1 %vm2060_vm0, %v2059_v0 }
 0x1f9   : > { %1673 = vmatprep.subr.bf16.mxu1 %v2059_v0 }
 0x1ff   : > { %1664 = vmatmul.mubr.msk.bf16.vlgmr.msra.gmra.mrb[16].mxu1 %vm612_vm3, %v959_v44 }
 0x200   : > { %1677 = vmatprep.mubr.msk.bf16.mxu1 %vm2060_vm0, %v2059_v0 }
 0x24d   : > { %v653_v45 = vpop.f32.mrb[4].mxu1 }
 0x24e   : > { %v1629_v46 = vpop.f32.mrb[5].mxu1  ;;  %v659_v47 = vsel %vm612_vm3, %v653_v45, -inf }
 0x24f   : > { %660 = vmax.xlane.f32.xlu0 %v659_v47  ;;  %v656_v48 = vpop.f32.mrb[6].mxu1 }
 0x250   : > { %v1630_v49 = vpop.f32.mrb[7].mxu1 }
 0x2c2   : > { %v767_v50 = vpop.f32.mrb[8].mxu1 }
 0x2c3   : > { %v1641_v51 = vpop.f32.mrb[9].mxu1  ;;  %v773_v52 = vsel %vm612_vm3, %v767_v50, -inf }
 0x2c4   : > { %774 = vmax.xlane.f32.xlu1 %v773_v52  ;;  %v770_v53 = vpop.f32.mrb[10].mxu1 }
 0x2c5   : > { %v1642_v54 = vpop.f32.mrb[11].mxu1 }
 0x2c6   : > { %v1817_v54 = vld [vmem:[#allocation8] sm:$0xff]  }
 0x2c7   : > { %1674 = vmatpush3.bf16.msra.mxu1 %v1817_v54 }
 0x2c8   : > { %1675 = vmatprep.subr.bf16.mxu1 %v2059_v0 }
 0x2ca   : > { %v886_v55 = vpop.f32.mrb[12].mxu1 }
 0x2cb   : > { %v1653_v56 = vpop.f32.mrb[13].mxu1  ;;  %v892_v57 = vsel %vm612_vm3, %v886_v55, -inf }
 0x2cc   : > { %893 = vmax.xlane.f32.xlu0 %v892_v57  ;;  %v889_v58 = vpop.f32.mrb[14].mxu1 }
 0x2cd   : > { %v1654_v59 = vpop.f32.mrb[15].mxu1 }
 0x2d2   : > { %v1002_v60 = vpop.f32.mrb[16].mxu1 }
 0x2d3   : > { %v1665_v61 = vpop.f32.mrb[17].mxu1  ;;  %v1008_v62 = vsel %vm612_vm3, %v1002_v60, -inf }
 0x2d4   : > { %1009 = vmax.xlane.f32.xlu0 %v1008_v62  ;;  %v1005_v63 = vpop.f32.mrb[18].mxu1 }
 0x2d5   : > { %v1666_v1 = vpop.f32.mrb[19].mxu1 }
 0x2dc   : > { %v661_v2 = vpop.xlane.xlu0 %660 }
 0x2dd   : > { %v662_v4 = vsub.f32 %v653_v45, %v661_v2 }
 0x2df   : > { %v663_v5 = vmul.f32 1.442695, %v662_v4 }
 0x2e1   : > { %1825 = vpow2.f32 %v663_v5 }
 0x2eb   : > { %v1826_v6 = vpop.eup %1825 }
 0x2ec   : > { %v665_v7 = vsel %vm612_vm3, %v1826_v6, 0.0 }
 0x2ed   : > { %666 = vadd.xlane.f32.xlu1 %v665_v7  ;;  %v1541_v7 = vld [vmem:[#allocation11 + $0x3] ss:$0 sm:$0xff] }
 0x2fe   : > { %788 = vrot.lane.b32.xlu1 %v1535_v8, %s2062_s30 }
 0x351   : > { %v775_v9 = vpop.xlane.xlu1 %774 }
 0x352   : > { %v776_v10 = vsub.f32 %v767_v50, %v775_v9 }
 0x354   : > { %v777_v11 = vmul.f32 1.442695, %v776_v10 }
 0x356   : > { %1827 = vpow2.f32 %v777_v11 }
 0x359   : > { %v894_v12 = vpop.xlane.xlu0 %893 }
 0x35a   : > { %v895_v13 = vsub.f32 %v886_v55, %v894_v12  ;;  %v1818_v55 = vld [vmem:[#allocation8 + $0x8] sm:$0xff]  }
 0x35b   : > { %1676 = vmatpush3.bf16.msra.mxu1 %v1818_v55 }
 0x35c   : > { %v896_v14 = vmul.f32 1.442695, %v895_v13  ;;  %1689 = vmatprep.subr.bf16.mxu1 %v2059_v0 }
 0x35e   : > { %1829 = vpow2.f32 %v896_v14 }
 0x360   : > { %v1828_v15 = vpop.eup %1827 }
 0x361   : > { %v1010_v16 = vpop.xlane.xlu0 %1009  ;;  %v779_v17 = vsel %vm612_vm3, %v1828_v15, 0.0 }
 0x362   : > { %v1011_v18 = vsub.f32 %v1002_v60, %v1010_v16  ;;  %780 = vadd.xlane.f32.xlu0 %v779_v17  ;;  %v1819_v17 = vld [vmem:[#allocation10] sm:$0xff]  }
 0x364   : > { %v1012_v19 = vmul.f32 1.442695, %v1011_v18  ;;  %v1820_v18 = vld [vmem:[#allocation10 + $0x8] sm:$0xff]  }
 0x366   : > { %1831 = vpow2.f32 %v1012_v19  ;;  %v1821_v19 = vld [vmem:[%s2484_s6] sm:$0xff]  }
 0x368   : > { %v1830_v20 = vpop.eup %1829 }
 0x369   : > { %v898_v21 = vsel %vm612_vm3, %v1830_v20, 0.0 }
 0x36a   : > { %899 = vadd.xlane.f32.xlu1 %v898_v21 }
 0x370   : > { %v1832_v22 = vpop.eup %1831 }
 0x371   : > { %v1014_v23 = vsel %vm612_vm3, %v1832_v22, 0.0 }
 0x372   : > { %1015 = vadd.xlane.f32.xlu0 %v1014_v23 }
 0x37a   : > { %v667_v24 = vpop.xlane.xlu1 %666 }
 0x37b   : > { %1833 = vrcp.f32 %v667_v24  ;;  %1020 = vrot.lane.b32.xlu1 %v1535_v8, %s2063_s17 }
 0x37e   : > { %v789_v27 = vpop.permute.xlu1 %788 }
 0x37f   : > { %v794_v29 = vsel %vm674_vm4, %v789_v27, 0 }
 0x385   : > { %v1834_v25 = vpop.eup %1833 }
 0x386   : > { %v669_v26 = vmul.f32 %v1834_v25, %v1826_v6 }
 0x388   : > { %904 = vrot.lane.b32.xlu0 %v1535_v8, %s2061_s13  ;;  %v670_v28 = vpack.c.bf16 %v669_v26, %v669_v26  ;;  %s396_s13 = scalar_lea.vmem [#allocation13], %s1517_s20 }
 0x389   : > { %s1393_s30 = sshll.u32 %s396_s13, 4  ;;  %s2432_s30 = int_to_ptr.vmem [resolvable:$true] %s1393_s30 }
 0x38a   : > { %1634 = vmatmul.mubr.msk.bf16.vlgmr.msra.gmra.mrb[8].mxu0 %vm612_vm3, %v670_v28  ;;  %s1959_s23 = scalar_lea.vmem %s2432_s30, 128  ;;  %p1966_p2 = scmp.lt.s32.totalorder %s2432_s30, %s1964_s27 }
 0x38b   : > { %1644 = vmatpush3.bf16.msra.mxu0 %v794_v29  ;;  %1645 = vmatprep.mubr.msk.bf16.mxu0 %vm2060_vm0, %v2059_v0  ;;  %p1960_p1 = scmp.ne.s32.totalorder %s2432_s30, %s1959_s23  ;;  %p1967_p3 = scmp.lt.s32.totalorder %s1965_s25, %s1959_s23 }
 0x38c   : > { %1655 = vmatprep.subr.bf16.mxu0 %v2059_v0 }
 0x38d   : > { %p1961_p11 = pnand %p1960_p1, %p2516_p10  ;;  %p1968_p5 = por %p1967_p3, %p1966_p2 }
 0x38f   : > { %p1962_p0 = pneg %p1961_p11 }
 0x391   : > { %p1969_p6 = pnand %p1968_p5, %p1962_p0 }
 0x3ef   : > { %v781_v30 = vpop.xlane.xlu0 %780 }
 0x3f0   : > { %1835 = vrcp.f32 %v781_v30 }
 0x3f7   : > { %v900_v31 = vpop.xlane.xlu1 %899 }
 0x3f8   : > { %1837 = vrcp.f32 %v900_v31  ;;  %v1545_v31 = vld [vmem:[#allocation11 + $0x5] ss:$0 sm:$0xff] }
 0x3fa   : > { %v1836_v32 = vpop.eup %1835 }
 0x3fb   : > { %v783_v33 = vmul.f32 %v1836_v32, %v1828_v15  ;;  %v1021_v40 = vpop.permute.xlu1 %1020 }
 0x3fc   : > { %v1026_v42 = vsel %vm674_vm4, %v1021_v40, 0 }
 0x3fd   : > { %v784_v34 = vpack.c.bf16 %v783_v33, %v783_v33  ;;  %v1546_v33 = vld [vmem:[#allocation11 + $0x6] ss:$0 sm:$0xff] }
 0x3ff   : > { %1646 = vmatmul.mubr.msk.bf16.vlgmr.msra.gmra.mrb[12].mxu0 %vm612_vm3, %v784_v34  ;;  %v1016_v35 = vpop.xlane.xlu0 %1015 }
 0x400   : > { %1839 = vrcp.f32 %v1016_v35  ;;  %1657 = vmatprep.mubr.msk.bf16.mxu0 %vm2060_vm0, %v2059_v0 }
 0x402   : > { %v1838_v36 = vpop.eup %1837 }
 0x403   : > { %v902_v37 = vmul.f32 %v1838_v36, %v1830_v20  ;;  %v905_v38 = vpop.permute.xlu0 %904  ;;  %v1822_v20 = vld [vmem:[%s2484_s6 + $0x8] sm:$0xff]  }
 0x404   : > { %v910_v39 = vsel %vm674_vm4, %v905_v38, 0  ;;  %v1824_v38 = vld [vmem:[%s2484_s6 + $0x18] sm:$0xff]  }
 0x405   : > { %1656 = vmatpush3.bf16.msra.mxu0 %v910_v39  ;;  %v903_v41 = vpack.c.bf16 %v902_v37, %v902_v37  ;;  %v1823_v37 = vld [vmem:[%s2484_s6 + $0x10] sm:$0xff]   ;;  %v1547_v39 = vld [vmem:[%s2485_s7] ss:$0 sm:$0xff] }
 0x406   : > { %1667 = vmatprep.subr.bf16.mxu0 %v2059_v0 }
 0x408   : > { %1658 = vmatmul.mubr.msk.bf16.vlgmr.msra.gmra.mrb[16].mxu0 %vm612_vm3, %v903_v41 }
 0x409   : > { %1668 = vmatpush3.bf16.msra.mxu0 %v1026_v42  ;;  %1669 = vmatprep.mubr.msk.bf16.mxu0 %vm2060_vm0, %v2059_v0 }
 0x40a   : > { %v1840_v43 = vpop.eup %1839  ;;  %1681 = vmatprep.subr.bf16.mxu0 %v2059_v0 }
 0x40b   : > { %v1018_v44 = vmul.f32 %v1840_v43, %v1832_v22 }
 0x40d   : > { %v1019_v45 = vpack.c.bf16 %v1018_v44, %v1018_v44 }
 0x410   : > { %1670 = vmatmul.mubr.msk.bf16.vlgmr.msra.gmra.mrb[20].mxu0 %vm612_vm3, %v1019_v45 }
 0x411   : > { %1685 = vmatprep.mubr.msk.bf16.mxu0 %vm2060_vm0, %v2059_v0  ;;  %1682 = vmatpush3.bf16.msra.mxu0 %v1819_v17 }
 0x412   : > { %1683 = vmatprep.subr.bf16.mxu0 %v2059_v0 }
 0x415   : > { %1684 = vmatpush3.bf16.msra.mxu0 %v1820_v18 }
 0x45d   : > { %v712_v46 = vpop.f32.mrb[8].mxu0 }
 0x45e   : > { %718 = vst.msk [vmem:[#allocation4] sm:$0xff] %vm612_vm3, %v712_v46  ;;  %v1635_v47 = vpop.f32.mrb[9].mxu0 }
 0x45f   : > { %v715_v48 = vpop.f32.mrb[10].mxu0  ;;  %v1551_v47 = vld [vmem:[#allocation11 + $0x4] ss:$0 sm:$0xff] }
 0x460   : > { %v1636_v49 = vpop.f32.mrb[11].mxu0 }
 0x4d2   : > { %v830_v50 = vpop.f32.mrb[12].mxu0 }
 0x4d3   : > { %837 = vrot.lane.b32.xlu1 %v830_v50, %s2064_s16  ;;  %v1647_v51 = vpop.f32.mrb[13].mxu0 }
 0x4d4   : > { %v833_v52 = vpop.f32.mrb[14].mxu0 }
 0x4d5   : > { %v1648_v53 = vpop.f32.mrb[15].mxu0 }
 0x4db   : > { %v946_v56 = vpop.f32.mrb[16].mxu0 }
 0x4dc   : > { %953 = vrot.lane.b32.xlu0 %v946_v56, %s2065_s26  ;;  %v1659_v57 = vpop.f32.mrb[17].mxu0  ;;  %s2430_s26 = scalar_lea.hbm %s2487_s9, %s1562_s28 }
 0x4dd   : > { %v949_v58 = vpop.f32.mrb[18].mxu0 }
 0x4de   : > { %v1660_v59 = vpop.f32.mrb[19].mxu0 }
 0x4e3   : > { %v1062_v60 = vpop.f32.mrb[20].mxu0 }
 0x4e4   : > { %1069 = vrot.lane.b32.xlu1 %v1062_v60, %s2066_s29  ;;  %v1671_v61 = vpop.f32.mrb[21].mxu0  ;;  %s1379_s29 = scalar_lea.sflag [#allocation7], %s394_s15 }
 0x4e5   : > { %v1065_v62 = vpop.f32.mrb[22].mxu0 }
 0x4e6   : > { %v1672_v63 = vpop.f32.mrb[23].mxu0 }
 0x545   : > { %v838_v1 = vpop.permute.xlu1 %837 }
 0x546   : > { %841 = vst.msk [vmem:[#allocation4] sm:$0xff] %vm840_vm5, %v838_v1 }
 0x54e   : > { %v954_v2 = vpop.permute.xlu0 %953 }
 0x54f   : > { %957 = vst.msk [vmem:[#allocation4] sm:$0xff] %vm956_vm6, %v954_v2 }
 0x556   : > { %v1070_v4 = vpop.permute.xlu1 %1069 }
 0x557   : > { %1073 = vst.msk [vmem:[#allocation4] sm:$0xff] %vm1072_vm7, %v1070_v4  ;;  %v1557_v4 = vld [vmem:[#allocation11 + $0x7] ss:$0 sm:$0xff] }
 0x55e   : > { %v1074_v5 = vld [vmem:[#allocation4] sm:$0xff] }
 0x55f   : > { %v1075_v6 = vpack.c.bf16 %v1074_v5, %v1074_v5 }
 0x561   : > { %1678 = vmatmul.mubr.msk.bf16.vlgmr.msra.gmra.mrb[20].mxu1 %vm429_vm1, %v1075_v6  ;;  %v1558_v6 = vld [vmem:[#allocation11 + $0x8] ss:$0 sm:$0xff] }
 0x562   : > { %1697 = vmatprep.mubr.msk.bf16.mxu1 %vm2060_vm0, %v2059_v0  ;;  %1690 = vmatpush3.bf16.msra.mxu1 %v1821_v19 }
 0x563   : > { %1691 = vmatprep.subr.bf16.mxu1 %v2059_v0 }
 0x566   : > { %1692 = vmatpush3.bf16.msra.mxu1 %v1822_v20 }
 0x567   : > { %1693 = vmatprep.subr.bf16.mxu1 %v2059_v0 }
 0x56a   : > { %1694 = vmatpush3.bf16.msra.mxu1 %v1823_v37 }
 0x56b   : > { %1695 = vmatprep.subr.bf16.mxu1 %v2059_v0 }
 0x56e   : > { %1696 = vmatpush3.bf16.msra.mxu1 %v1824_v38 }
 0x634   : > { %v1134_v8 = vpop.f32.mrb[20].mxu1 }
 0x635   : > { %v1135_v9 = vadd.f32 %v1541_v7, %v1134_v8  ;;  %v1679_v10 = vpop.f32.mrb[21].mxu1 }
 0x636   : > { %v1137_v11 = vpop.f32.mrb[22].mxu1 }
 0x637   : > { %v1140_v12 = vadd.f32 %v1135_v9, %v2307_v3  ;;  %v1680_v13 = vpop.f32.mrb[23].mxu1 }
 0x639   : > { %v1143_v14 = vsel %vm429_vm1, %v1140_v12, 0.0  ;;  %v1147_v15 = vmul.f32 %v1140_v12, %v1140_v12 }
 0x63a   : > { %1144 = vadd.xlane.f32.xlu0 %v1143_v14 }
 0x63b   : > { %v1148_v16 = vsel %vm429_vm1, %v1147_v15, 0.0 }
 0x63c   : > { %1149 = vadd.xlane.f32.xlu1 %v1148_v16 }
 0x6c7   : > { %v1145_v21 = vpop.xlane.xlu0 %1144 }
 0x6c8   : > { %v1146_v22 = vmul.f32 0.03125, %v1145_v21 }
 0x6c9   : > { %v1150_v23 = vpop.xlane.xlu1 %1149 }
 0x6ca   : > { %v1152_v24 = vmul.f32 %v1146_v22, %v1146_v22  ;;  %v1151_v25 = vmul.f32 0.03125, %v1150_v23  ;;  %v1155_v29 = vsub.f32 %v1140_v12, %v1146_v22  ;;  %v1559_v22 = vld [vmem:[#allocation11 + $0x9] ss:$0 sm:$0xff] }
 0x6cc   : > { %v1153_v26 = vsub.f32 %v1151_v25, %v1152_v24  ;;  %v1560_v24 = vld [vmem:[#allocation11 + $0xa] ss:$0 sm:$0xff] }
 0x6ce   : > { %v1154_v27 = vmax.f32 %v1153_v26, 0.0 }
 0x6d0   : > { %v1156_v28 = vadd.f32 1e-05, %v1154_v27 }
 0x6d2   : > { %1841 = vrsqrt.f32 %v1156_v28 }
 0x6dc   : > { %v1842_v30 = vpop.eup %1841 }
 0x6dd   : > { %v1158_v32 = vmul.f32 %v1842_v30, %v1155_v29 }
 0x6df   : > { %v1163_v34 = vmul.f32 %v1545_v31, %v1158_v32 }
 0x6e1   : > { %v1168_v35 = vadd.f32 %v1546_v33, %v1163_v34 }
 0x6e3   : > { %v1169_v36 = vpack.c.bf16 %v1168_v35, %v1168_v35 }
 0x6e5   : > { %1686 = vmatmul.mubr.msk.bf16.vlgmr.msra.gmra.mrb[24].mxu0 %vm429_vm1, %v1169_v36 }
 0x7b8   : > { %v1230_v40 = vpop.f32.mrb[24].mxu0 }
 0x7b9   : > { %v1231_v41 = vadd.f32 %v1547_v39, %v1230_v40  ;;  %v1687_v42 = vpop.f32.mrb[25].mxu0 }
 0x7ba   : > { %v1233_v43 = vpop.f32.mrb[26].mxu0 }
 0x7bb   : > { %v1236_v44 = vmax.f32 %v1231_v41, 0.0  ;;  %v1688_v45 = vpop.f32.mrb[27].mxu0 }
 0x7bd   : > { %v1237_v46 = vpack.c.bf16 %v1236_v44, %v1236_v44 }
 0x7bf   : > { %1698 = vmatmul.mubr.msk.bf16.vlgmr.msra.gmra.mrb[24].mxu1 %vm1275_vm8, %v1237_v46 }
 0x892   : > { %v1313_v0 = vpop.f32.mrb[24].mxu1 }
 0x893   : > { %v1314_v48 = vadd.f32 %v1551_v47, %v1313_v0  ;;  %v1699_v49 = vpop.f32.mrb[25].mxu1 }
 0x894   : > { %v1316_v50 = vpop.f32.mrb[26].mxu1 }
 0x895   : > { %v1319_v51 = vadd.f32 %v1314_v48, %v1168_v35  ;;  %v1700_v52 = vpop.f32.mrb[27].mxu1 }
 0x897   : > { %v1322_v53 = vsel %vm429_vm1, %v1319_v51, 0.0  ;;  %v1326_v54 = vmul.f32 %v1319_v51, %v1319_v51 }
 0x898   : > { %1323 = vadd.xlane.f32.xlu0 %v1322_v53 }
 0x899   : > { %v1327_v55 = vsel %vm429_vm1, %v1326_v54, 0.0 }
 0x89c   : > { %1328 = vadd.xlane.f32.xlu0 %v1327_v55 }
 0x925   : > { %v1324_v56 = vpop.xlane.xlu0 %1323 }
 0x926   : > { %v1325_v57 = vmul.f32 0.03125, %v1324_v56 }
 0x928   : > { %v1331_v59 = vmul.f32 %v1325_v57, %v1325_v57  ;;  %v1334_v1 = vsub.f32 %v1319_v51, %v1325_v57 }
 0x929   : > { %v1329_v58 = vpop.xlane.xlu0 %1328 }
 0x92a   : > { %v1330_v60 = vmul.f32 0.03125, %v1329_v58 }
 0x92c   : > { %v1332_v61 = vsub.f32 %v1330_v60, %v1331_v59 }
 0x92e   : > { %v1333_v62 = vmax.f32 %v1332_v61, 0.0 }
 0x930   : > { %v1335_v63 = vadd.f32 1e-05, %v1333_v62 }
 0x932   : > { %1843 = vrsqrt.f32 %v1335_v63 }
 0x93c   : > { %v1844_v2 = vpop.eup %1843 }
 0x93d   : > { %v1337_v5 = vmul.f32 %v1844_v2, %v1334_v1 }
 0x93f   : > { %v1342_v7 = vmul.f32 %v1557_v4, %v1337_v5 }
 0x941   : > { %v1347_v8 = vadd.f32 %v1558_v6, %v1342_v7 }
 0x943   : > { %v1350_v9 = vsel %vm429_vm1, %v1347_v8, 0.0  ;;  %v1354_v10 = vmul.f32 %v1347_v8, %v1347_v8 }
 0x944   : > { %1351 = vadd.xlane.f32.xlu1 %v1350_v9 }
 0x945   : > { %v1355_v11 = vsel %vm429_vm1, %v1354_v10, 0.0 }
 0x946   : > { %1356 = vadd.xlane.f32.xlu0 %v1355_v11 }
 0x9d1   : > { %v1352_v12 = vpop.xlane.xlu1 %1351 }
 0x9d2   : > { %v1353_v13 = vmul.f32 0.03125, %v1352_v12 }
 0x9d3   : > { %v1357_v14 = vpop.xlane.xlu0 %1356 }
 0x9d4   : > { %v1359_v15 = vmul.f32 %v1353_v13, %v1353_v13  ;;  %v1358_v16 = vmul.f32 0.03125, %v1357_v14  ;;  %v1362_v20 = vsub.f32 %v1347_v8, %v1353_v13 }
 0x9d6   : > { %v1360_v17 = vsub.f32 %v1358_v16, %v1359_v15 }
 0x9d8   : > { %v1361_v18 = vmax.f32 %v1360_v17, 0.0 }
 0x9da   : > { %v1363_v19 = vadd.f32 1e-06, %v1361_v18 }
 0x9dc   : > { %1845 = vrsqrt.f32 %v1363_v19 }
 0x9e6   : > { %v1846_v21 = vpop.eup %1845 }
 0x9e7   : > { %v1365_v23 = vmul.f32 %v1846_v21, %v1362_v20 }
 0x9e9   : > { %v1370_v25 = vmul.f32 %v1559_v22, %v1365_v23 }
 0x9eb   : > { %v1375_v26 = vadd.f32 %v1560_v24, %v1370_v25 }
 0x9ed   : > { %v1376_v27 = vadd.f32 %v1375_v26, %v2307_v3 }
 0x9ef   : > { %1377 = vst.msk [vmem:[%s396_s13] sm:$0xff] %vm429_vm1, %v1376_v27 }
 0x9f0   : > { %1972 = shalt.err (!%p1969_p6)
}
 0x9f1   : > { %s1973_s24 = scalar_lea.hbm %s2430_s26, 128  ;;  %s1977_s14 = scalar_lea.hbm %s2487_s9, 256 }
 0x9f2   : > { %p1974_p7 = scmp.ne.s32.totalorder %s2430_s26, %s1973_s24  ;;  %p1978_p4 = scmp.lt.u32.totalorder %s2430_s26, %s2487_s9 }
 0x9f3   : > { %p1979_p8 = scmp.lt.u32.totalorder %s1977_s14, %s1973_s24  ;;  %p1981_p1 = scmp.lt.u32.totalorder %s1973_s24, %s2430_s26 }
 0x9f4   : > { %p1975_p9 = pnand %p1974_p7, %p2516_p10 }
 0x9f5   : > { %p1980_p13 = por %p1979_p8, %p1978_p4 }
 0x9f6   : > { %p1976_p12 = pneg %p1975_p9 }
 0x9f7   : > { %p1982_p11 = por %p1981_p1, %p1980_p13 }
 0x9f9   : > { %p1983_p0 = pnand %p1982_p11, %p1976_p12 }
 0x9fb   : > { %1986 = shalt.err (!%p1983_p0)
}
 0x9fc   : > { %1717 = dma.vmem_to_hbm [thread:$0]  (%p2516_p10), %s2432_s30, 128, %s2430_s26, %s1379_s29  }
 0x9fd PF: > { %s2517_s22 = sld [smem:[#allocation21_spill]]  ;;  %s2518_s15 = sld [smem:[#allocation18_spill]] }
 0x9fe   : > { %s2519_s20 = sld [smem:[#allocation23_spill]] }
 0xa03   : > { %p1744_p2 = scmp.ge.s32.totalorder %s2517_s22, 2  ;;  %s1405_s28 = sand.u32 1, %s2518_s15  }
 0xa04   : > { %p2520_p3 = scmp.ne.s32.totalorder %s2519_s20, 0  ;;  %s1406_s13 = scalar_lea.sflag [#allocation7], %s1405_s28 }
 0xa06   : > { %p1733_p5 = pnand %p1744_p2, %p2520_p3 }
 0xa08   : > { %2024 = dma.done.wait (!%p1733_p5), %s1406_s13, 128  }
 0xa09   : > { %2026 = vsyncadd (!%p1733_p5), %s1406_s13, 4294967168  ;;  %s25_s14 = sadd.s32 1, %s2517_s22   ;;  %s2521_s17 = sld [smem:[#allocation19_spill]] }
 0xa0a   : > { %p22_p6 = scmp.ge.s32.totalorder %s25_s14, 4   ;;  %s2522_s11 = sld [smem:[#allocation24_spill]] }
 0xa0b   : > { %s2523_s12 = sld [smem:[#allocation20_spill]]  ;;  %s2524_s13 = sld [smem:[#allocation22_spill]] }
 0xa0c   : > { %s2525_s30 = smov %s2033_s10  ;;  %24 = sbr.rel (!%p22_p6) target bundleno = 9 (0x9), region = 113 }
 0xa0f   : > { %s2526_s10 = smov %s2521_s17 }
 0xa13   :  { %1411 = vsyncpa [#allocation6], 1 }
 0xa14   :  { %1413 = vsyncpa [#allocation6 + $0x1], 1 }
 0xa15   :  { %1414 = vsyncpa [#allocation9], 1 }
 0xa16   :  { %1415 = vsyncpa [#allocation12], 1 }
 0xa17   :  { %1416 = vsyncpa [#allocation7], 1 }
 0xa18   :  { %1418 = vsyncpa [#allocation7 + $0x1], 1 }

</bundles_post_ra>
